<compile_context>
chip_gen: v7x
topology: tpu7x:2x2x1
jax: 0.10.0
libtpu: 0.0.40
codegen_flags: <defaults>
</compile_context>

<pallas_src>
import functools

import jax
import jax.numpy as jnp
from jax.experimental import pallas as pl
from jax.experimental.pallas import tpu as pltpu

NUM_CLASSES = 12                  # len(class_names) in YOLOv8Security
REG_MAX = 16                      # YOLOv8 DFL bins
NO = 4 * REG_MAX + NUM_CLASSES    # 76 raw output channels per cell
NO_PAD = 128                      # lane-dense padded head width
R_TILE_MAX = 4096                 # max output rows per grid step


def _round_up(x, m):
    return ((x + m - 1) // m) * m


def _tile_plan(ho, wq, r_tile_max=R_TILE_MAX):
    """Static row-tiling plan for one scale.

    Returns (r, r_tile, num_tiles, rpad, window, lpad) where r = ho*wq is the
    number of real output rows (incl. the junk column), window is the per-tile
    input slab (tile + halo covering the max tap offset wq+1), and lpad is the
    padded row count of the phase-split input.
    """
    r = ho * wq
    r_tile = min(r_tile_max, _round_up(r, 8))
    num_tiles = -(-r // r_tile)
    rpad = num_tiles * r_tile
    halo = _round_up(wq + 2, 8)
    window = r_tile + halo
    lpad = _round_up(max((ho + 1) * wq, rpad + halo), 8)
    return r, r_tile, num_tiles, rpad, window, lpad


# ----------------------------------------------------------------------------
# Pallas kernel: fused 3x3/s2 conv (single 9*Cin-deep dot) + bias + SiLU + head
# ----------------------------------------------------------------------------
def _conv_silu_head_body(xp_ref, w_ref, b_ref, wh_ref, bh_ref, d_ref, f_ref,
                         *, wq, window):
    """One (batch, row-tile) grid step of one scale.

    xp_ref : (4, Lpad, Cin)     bf16  stride-2 phase-split padded input
    w_ref  : (9*Cin, Cout)      bf16  conv weights, flat tap-major
    b_ref  : (1, Cout)          f32   conv bias
    wh_ref : (Cout, NO_PAD)     bf16  1x1 head weights (zero-padded 76 -> 128)
    bh_ref : (1, NO_PAD)        f32   head bias (zero-padded)
    d_ref  : (r_tile, NO_PAD)   bf16  raw head out (lane-dense store)
    f_ref  : (r_tile, Cout)     bf16  features out (P3 only; None for P4)
    """
    r_tile = d_ref.shape[0]
    tstart = pl.multiple_of(pl.program_id(1) * r_tile, 8)

    # One aligned dynamic window per stride-2 phase; the 9 conv taps are then
    # static row-slices of these windows (offsets in {0, 1, wq, wq+1}).
    wins = [xp_ref[p, pl.ds(tstart, window), :] for p in range(4)]

    taps = []
    for di in range(3):
        for dj in range(3):
            p = (di & 1) * 2 + (dj & 1)
            off = (di >> 1) * wq + (dj >> 1)
            taps.append(wins[p][off:off + r_tile, :])
    lhs = jnp.concatenate(taps, axis=-1)              # (r_tile, 9*Cin) bf16

    # Single K = 9*Cin MXU matmul instead of nine K = Cin accumulating dots.
    acc = jnp.dot(lhs, w_ref[...], preferred_element_type=jnp.float32)
    acc = acc + b_ref[...]                            # bias in f32 (VPU)
    feat = acc * jax.nn.sigmoid(acc)                  # SiLU in f32 (VPU + EUP)
    if f_ref is not None:
        f_ref[...] = feat.astype(f_ref.dtype)

    # Fused 1x1 detection head; lane-dense 128-wide bf16 store.
    det = jnp.dot(feat.astype(wh_ref.dtype), wh_ref[...],
                  preferred_element_type=jnp.float32)
    d_ref[...] = (det + bh_ref[...]).astype(d_ref.dtype)


def _kernel_with_features(xp, w, b, wh, bh, d, f, *, wq, window):
    _conv_silu_head_body(xp, w, b, wh, bh, d, f, wq=wq, window=window)


def _kernel_head_only(xp, w, b, wh, bh, d, *, wq, window):
    _conv_silu_head_body(xp, w, b, wh, bh, d, None, wq=wq, window=window)


def conv_silu_head(xp, w, b, wh, bh, *, ho, wq, with_features):
    """xp: (B, 4, Lpad, Cin) bf16 -> detections (B, Rpad, 128) bf16
                                     [+ features (B, Rpad, Cout) bf16]."""
    B, _, lpad, cin = xp.shape
    kdim, cout = w.shape
    nop = wh.shape[1]
    _, r_tile, num_tiles, rpad, window, lpad_plan = _tile_plan(ho, wq)
    assert lpad == lpad_plan and kdim == 9 * cin

    if with_features:
        kernel = functools.partial(_kernel_with_features, wq=wq, window=window)
    else:
        kernel = functools.partial(_kernel_head_only, wq=wq, window=window)

    out_shape = [jax.ShapeDtypeStruct((B, rpad, nop), jnp.bfloat16)]
    out_specs = [pl.BlockSpec((None, r_tile, nop), lambda bi, ti: (bi, ti, 0))]
    if with_features:
        out_shape.append(jax.ShapeDtypeStruct((B, rpad, cout), jnp.bfloat16))
        out_specs.append(
            pl.BlockSpec((None, r_tile, cout), lambda bi, ti: (bi, ti, 0)))

    # Explicit VMEM budget from the actual block sizes (+ in-kernel temps).
    need = (2 * 4 * lpad * cin * 2                        # xp block (x2 buffers)
            + 2 * (kdim * cout + cout * nop) * 2          # bf16 weights
            + 2 * (cout + nop) * 4                        # f32 biases
            + 2 * r_tile * nop * 2                        # d block (x2 buffers)
            + (2 * r_tile * cout * 2 if with_features else 0)
            + 4 * window * cin * 2                        # phase windows
            + r_tile * kdim * 2                           # concatenated taps
            + r_tile * (cout + nop) * 4)                  # f32 feat + det temps
    vmem_limit = int(min(max(2 * need, 32 * 1024 * 1024), 100 * 1024 * 1024))

    outs = pl.pallas_call(
        kernel,
        out_shape=tuple(out_shape),
        grid_spec=pltpu.PrefetchScalarGridSpec(
            num_scalar_prefetch=0,
            grid=(B, num_tiles),
            in_specs=[
                pl.BlockSpec((None, 4, lpad, cin), lambda bi, ti: (bi, 0, 0, 0)),
                pl.BlockSpec((kdim, cout), lambda bi, ti: (0, 0)),
                pl.BlockSpec((1, cout), lambda bi, ti: (0, 0)),
                pl.BlockSpec((cout, nop), lambda bi, ti: (0, 0)),
                pl.BlockSpec((1, nop), lambda bi, ti: (0, 0)),
            ],
            out_specs=tuple(out_specs),
        ),
        compiler_params=pltpu.CompilerParams(
            dimension_semantics=("parallel", "parallel"),
            vmem_limit_bytes=vmem_limit),
    )(xp, w, b, wh, bh)
    d = outs[0]
    f = outs[1] if with_features else None
    return d, f


# ----------------------------------------------------------------------------
# Plain-JAX glue: stride-2 phase split (space-to-depth), bf16, ~0.5x input bytes
# ----------------------------------------------------------------------------
def phase_split(x_nhwc, ho, wo, lpad, cin_pad=None):
    """Pad (conv pad=1) and rearrange NHWC input into stride-2 phases (bf16).

    Returns (B, 4, lpad, C') such that
        out[b, pi*2+pj, i*(wo+1)+j, c] == x_padded[b, 2*i+pi, 2*j+pj, c]
    with rows beyond (ho+1)*(wo+1) (and padded channels) zero-filled.
    """
    B, H, W, C = x_nhwc.shape
    x = x_nhwc.astype(jnp.bfloat16)
    hq, wq = ho + 1, wo + 1
    he, we = 2 * hq, 2 * wq
    x = jnp.pad(x, ((0, 0), (1, he - H - 1), (1, we - W - 1), (0, 0)))
    x = x.reshape(B, hq, 2, wq, 2, C)
    x = jnp.transpose(x, (0, 2, 4, 1, 3, 5)).reshape(B, 4, hq * wq, C)
    pad_c = 0 if cin_pad is None else cin_pad - C
    return jnp.pad(x, ((0, 0), (0, 0), (0, lpad - hq * wq), (0, pad_c)))


# ----------------------------------------------------------------------------
# Model: deterministic synthetic parameters + forward
# ----------------------------------------------------------------------------
def init_params(key, cin=3, cin_pad=8, c1=16, c2=32):
    ks = jax.random.split(key, 8)
    s = 0.05

    def bf(a):
        return a.astype(jnp.bfloat16)

    w1 = s * jax.random.normal(ks[0], (9, cin, c1), jnp.float32)
    w1 = jnp.pad(w1, ((0, 0), (0, cin_pad - cin), (0, 0))).reshape(9 * cin_pad, c1)
    w2 = (s * jax.random.normal(ks[2], (9, c1, c2), jnp.float32)).reshape(9 * c1, c2)
    wh3 = s * jax.random.normal(ks[4], (c1, NO), jnp.float32)
    wh4 = s * jax.random.normal(ks[6], (c2, NO), jnp.float32)
    return {
        # conv weights flattened tap-major: (9*Cin_pad, Cout), bf16 for the MXU
        "w1": bf(w1),
        "b1": s * jax.random.normal(ks[1], (1, c1), jnp.float32),
        "w2": bf(w2),
        "b2": s * jax.random.normal(ks[3], (1, c2), jnp.float32),
        # 1x1 head weights/bias zero-padded 76 -> 128 lanes (lane-dense stores)
        "wh3": bf(jnp.pad(wh3, ((0, 0), (0, NO_PAD - NO)))),
        "bh3": jnp.pad(s * jax.random.normal(ks[5], (1, NO), jnp.float32),
                       ((0, 0), (0, NO_PAD - NO))),
        "wh4": bf(jnp.pad(wh4, ((0, 0), (0, NO_PAD - NO)))),
        "bh4": jnp.pad(s * jax.random.normal(ks[7], (1, NO), jnp.float32),
                       ((0, 0), (0, NO_PAD - NO))),
    }


def yolov8_security_forward(x_nchw, params):
    """x_nchw: (B, 3, H, W) -> raw YOLOv8-style detections (B, 76, n_cells)."""
    x = jnp.transpose(x_nchw, (0, 2, 3, 1))                          # NHWC
    B, H, W, _ = x.shape

    # --- P3 scale: stem conv + SiLU + fused head ---------------------------
    H1, W1 = (H - 1) // 2 + 1, (W - 1) // 2 + 1
    wq1 = W1 + 1
    R1, _, _, _, _, lpad1 = _tile_plan(H1, wq1)
    xp1 = phase_split(x, H1, W1, lpad1, cin_pad=8)
    d1, f1 = conv_silu_head(xp1, params["w1"], params["b1"],
                            params["wh3"], params["bh3"],
                            ho=H1, wq=wq1, with_features=True)
    c1 = f1.shape[-1]
    # strip padded rows, the junk column (j == W1) and padded head channels
    f3 = f1[:, :R1, :].reshape(B, H1, wq1, c1)[:, :, :W1, :]         # bf16
    d3 = d1[:, :R1, :].reshape(B, H1, wq1, NO_PAD)[:, :, :W1, :NO]   # bf16

    # --- P4 scale: stage conv + SiLU + head only ----------------------------
    H2, W2 = (H1 - 1) // 2 + 1, (W1 - 1) // 2 + 1
    wq2 = W2 + 1
    R2, _, _, _, _, lpad2 = _tile_plan(H2, wq2)
    xp2 = phase_split(f3, H2, W2, lpad2)
    d2, _ = conv_silu_head(xp2, params["w2"], params["b2"],
                           params["wh4"], params["bh4"],
                           ho=H2, wq=wq2, with_features=False)
    d4 = d2[:, :R2, :].reshape(B, H2, wq2, NO_PAD)[:, :, :W2, :NO]

    pred = jnp.concatenate([d3.reshape(B, H1 * W1, NO),
                            d4.reshape(B, H2 * W2, NO)], axis=1)     # (B,cells,76)
    return jnp.transpose(pred, (0, 2, 1)).astype(jnp.float32)        # (B,76,cells)


# ----------------------------------------------------------------------------
# Pure-JAX reference (f32 convolutions) for correctness checking
# ----------------------------------------------------------------------------
def _ref_forward(x_nchw, params):
    x = jnp.transpose(x_nchw, (0, 2, 3, 1)).astype(jnp.float32)

    def conv_silu(inp, wflat, b):
        cin = inp.shape[-1]
        k, cout = wflat.shape
        cin_pad = k // 9
        w = wflat.astype(jnp.float32).reshape(3, 3, cin_pad, cout)[:, :, :cin, :]
        y = jax.lax.conv_general_dilated(
            inp, w, window_strides=(2, 2), padding=((1, 1), (1, 1)),
            dimension_numbers=("NHWC", "HWIO", "NHWC"))
        y = y + b.reshape(1, 1, 1, cout)
        return y * jax.nn.sigmoid(y)

    def head(f, wh, bh):
        B, Hf, Wf, Cf = f.shape
        d = f.reshape(B, Hf * Wf, Cf) @ wh.astype(jnp.float32)[:, :NO]
        return d + bh[:, :NO].reshape(1, 1, NO)

    f3 = conv_silu(x, params["w1"], params["b1"])
    f4 = conv_silu(f3, params["w2"], params["b2"])
    pred = jnp.concatenate([head(f3, params["wh3"], params["bh3"]),
                            head(f4, params["wh4"], params["bh4"])], axis=1)
    return jnp.transpose(pred, (0, 2, 1))


if __name__ == "__main__":
    key = jax.random.PRNGKey(0)
    pkey, xkey = jax.random.split(key)

    params = init_params(pkey)
    x = jax.random.normal(xkey, (2, 3, 16, 16), jnp.float32)   # NCHW input

    fwd = jax.jit(yolov8_security_forward)
    out = jax.block_until_ready(fwd(x, params))

    # 16x16 input -> P3 8x8 (64 cells) + P4 4x4 (16 cells) = 80 cells
    assert out.shape == (2, NO, 80), out.shape
    assert out.dtype == jnp.float32
    assert bool(jnp.all(jnp.isfinite(out)))

    ref = _ref_forward(x, params)
    err = float(jnp.max(jnp.abs(out - ref)))
    assert err < 5e-2, f"max abs err {err}"

    print("KERNEL_OK")
</pallas_src>

<mosaic_0001>
module attributes {stable_mosaic.version = 11 : i64} {
  func.func @_kernel_with_features(%arg0: i32, %arg1: i32, %arg2: memref<1x4x88x8xbf16, #tpu.memory_space<vmem>>, %arg3: memref<72x16xbf16, #tpu.memory_space<vmem>>, %arg4: memref<1x16xf32, #tpu.memory_space<vmem>>, %arg5: memref<16x128xbf16, #tpu.memory_space<vmem>>, %arg6: memref<1x128xf32, #tpu.memory_space<vmem>>, %arg7: memref<1x72x128xbf16, #tpu.memory_space<vmem>>, %arg8: memref<1x72x16xbf16, #tpu.memory_space<vmem>>) attributes {dimension_semantics = [#tpu.dimension_semantics<parallel>, #tpu.dimension_semantics<parallel>], iteration_bounds = array<i64: 2, 1>, scalar_prefetch = 0 : i64, scratch_operands = 0 : i64, tpu.core_type = #tpu.core_type<tc>, window_params = [{transform_indices = @transform_0, window_bounds = array<i64: 1, 4, 88, 8>}, {pipeline_mode = #tpu.pipeline_mode<synchronous>, transform_indices = @transform_1, window_bounds = array<i64: 72, 16>}, {pipeline_mode = #tpu.pipeline_mode<synchronous>, transform_indices = @transform_2, window_bounds = array<i64: 1, 16>}, {pipeline_mode = #tpu.pipeline_mode<synchronous>, transform_indices = @transform_3, window_bounds = array<i64: 16, 128>}, {pipeline_mode = #tpu.pipeline_mode<synchronous>, transform_indices = @transform_4, window_bounds = array<i64: 1, 128>}, {transform_indices = @transform_5, window_bounds = array<i64: 1, 72, 128>}, {transform_indices = @transform_6, window_bounds = array<i64: 1, 72, 16>}]} {
    %c72_i32 = arith.constant 72 : i32
    %0 = arith.muli %arg1, %c72_i32 : i32
    %1 = tpu.assume_multiple %0, 8 : i32
    %c0 = arith.constant 0 : index
    %c0_0 = arith.constant 0 : index
    %2 = arith.index_cast %1 : i32 to index
    %c0_1 = arith.constant 0 : index
    %3 = vector.load %arg2[%c0, %c0_0, %2, %c0_1] : memref<1x4x88x8xbf16, #tpu.memory_space<vmem>>, vector<1x1x88x8xbf16>
    %4 = vector.shape_cast %3 : vector<1x1x88x8xbf16> to vector<88x8xbf16>
    %c0_2 = arith.constant 0 : index
    %c1 = arith.constant 1 : index
    %5 = arith.index_cast %1 : i32 to index
    %c0_3 = arith.constant 0 : index
    %6 = vector.load %arg2[%c0_2, %c1, %5, %c0_3] : memref<1x4x88x8xbf16, #tpu.memory_space<vmem>>, vector<1x1x88x8xbf16>
    %7 = vector.shape_cast %6 : vector<1x1x88x8xbf16> to vector<88x8xbf16>
    %c0_4 = arith.constant 0 : index
    %c2 = arith.constant 2 : index
    %8 = arith.index_cast %1 : i32 to index
    %c0_5 = arith.constant 0 : index
    %9 = vector.load %arg2[%c0_4, %c2, %8, %c0_5] : memref<1x4x88x8xbf16, #tpu.memory_space<vmem>>, vector<1x1x88x8xbf16>
    %10 = vector.shape_cast %9 : vector<1x1x88x8xbf16> to vector<88x8xbf16>
    %c0_6 = arith.constant 0 : index
    %c3 = arith.constant 3 : index
    %11 = arith.index_cast %1 : i32 to index
    %c0_7 = arith.constant 0 : index
    %12 = vector.load %arg2[%c0_6, %c3, %11, %c0_7] : memref<1x4x88x8xbf16, #tpu.memory_space<vmem>>, vector<1x1x88x8xbf16>
    %13 = vector.shape_cast %12 : vector<1x1x88x8xbf16> to vector<88x8xbf16>
    %14 = vector.extract_strided_slice %4 {offsets = [0, 0], sizes = [72, 8], strides = [1, 1]} : vector<88x8xbf16> to vector<72x8xbf16>
    %15 = vector.extract_strided_slice %7 {offsets = [0, 0], sizes = [72, 8], strides = [1, 1]} : vector<88x8xbf16> to vector<72x8xbf16>
    %16 = vector.extract_strided_slice %4 {offsets = [1, 0], sizes = [72, 8], strides = [1, 1]} : vector<88x8xbf16> to vector<72x8xbf16>
    %17 = vector.extract_strided_slice %10 {offsets = [0, 0], sizes = [72, 8], strides = [1, 1]} : vector<88x8xbf16> to vector<72x8xbf16>
    %18 = vector.extract_strided_slice %13 {offsets = [0, 0], sizes = [72, 8], strides = [1, 1]} : vector<88x8xbf16> to vector<72x8xbf16>
    %19 = vector.extract_strided_slice %10 {offsets = [1, 0], sizes = [72, 8], strides = [1, 1]} : vector<88x8xbf16> to vector<72x8xbf16>
    %20 = vector.extract_strided_slice %4 {offsets = [9, 0], sizes = [72, 8], strides = [1, 1]} : vector<88x8xbf16> to vector<72x8xbf16>
    %21 = vector.extract_strided_slice %7 {offsets = [9, 0], sizes = [72, 8], strides = [1, 1]} : vector<88x8xbf16> to vector<72x8xbf16>
    %22 = vector.extract_strided_slice %4 {offsets = [10, 0], sizes = [72, 8], strides = [1, 1]} : vector<88x8xbf16> to vector<72x8xbf16>
    %23 = tpu.concatenate %14, %15, %16, %17, %18, %19, %20, %21, %22 in 1 : vector<72x8xbf16>, vector<72x8xbf16>, vector<72x8xbf16>, vector<72x8xbf16>, vector<72x8xbf16>, vector<72x8xbf16>, vector<72x8xbf16>, vector<72x8xbf16>, vector<72x8xbf16> -> vector<72x72xbf16>
    %c0_8 = arith.constant 0 : index
    %c0_9 = arith.constant 0 : index
    %24 = vector.load %arg3[%c0_8, %c0_9] : memref<72x16xbf16, #tpu.memory_space<vmem>>, vector<72x16xbf16>
    %cst = arith.constant dense<0.000000e+00> : vector<72x16xf32>
    %25 = tpu.matmul %23, %24, %cst {dimension_numbers = #tpu.dot_dimension_numbers<[1], [0], [0], [1], [0, 0, 1, 1], [], []>} : vector<72x72xbf16>, vector<72x16xbf16>, vector<72x16xf32> -> vector<72x16xf32>
    %c0_10 = arith.constant 0 : index
    %c0_11 = arith.constant 0 : index
    %26 = vector.load %arg4[%c0_10, %c0_11] : memref<1x16xf32, #tpu.memory_space<vmem>>, vector<1x16xf32>
    %27 = vector.broadcast %26 : vector<1x16xf32> to vector<72x16xf32>
    %28 = arith.addf %25, %27 : vector<72x16xf32>
    %29 = arith.negf %28 : vector<72x16xf32>
    %30 = math.exp %29 : vector<72x16xf32>
    %cst_12 = arith.constant 1.000000e+00 : f32
    %31 = vector.broadcast %cst_12 : f32 to vector<72x16xf32>
    %32 = arith.addf %31, %30 : vector<72x16xf32>
    %33 = arith.divf %31, %32 : vector<72x16xf32>
    %34 = arith.mulf %28, %33 : vector<72x16xf32>
    %35 = arith.truncf %34 : vector<72x16xf32> to vector<72x16xbf16>
    %c0_13 = arith.constant 0 : index
    %c0_14 = arith.constant 0 : index
    %c0_15 = arith.constant 0 : index
    %36 = vector.load %arg8[%c0_13, %c0_14, %c0_15] : memref<1x72x16xbf16, #tpu.memory_space<vmem>>, vector<1x72x16xbf16>
    %37 = vector.shape_cast %36 : vector<1x72x16xbf16> to vector<72x16xbf16>
    %38 = vector.shape_cast %35 : vector<72x16xbf16> to vector<1x72x16xbf16>
    tpu.vector_store %arg8[%c0_13, %c0_14, %c0_15], %38 {strides = array<i32>} : memref<1x72x16xbf16, #tpu.memory_space<vmem>>, vector<1x72x16xbf16>,
    %39 = arith.truncf %34 : vector<72x16xf32> to vector<72x16xbf16>
    %c0_16 = arith.constant 0 : index
    %c0_17 = arith.constant 0 : index
    %40 = vector.load %arg5[%c0_16, %c0_17] : memref<16x128xbf16, #tpu.memory_space<vmem>>, vector<16x128xbf16>
    %cst_18 = arith.constant dense<0.000000e+00> : vector<72x128xf32>
    %41 = tpu.matmul %39, %40, %cst_18 {dimension_numbers = #tpu.dot_dimension_numbers<[1], [0], [0], [1], [0, 0, 1, 1], [], []>} : vector<72x16xbf16>, vector<16x128xbf16>, vector<72x128xf32> -> vector<72x128xf32>
    %c0_19 = arith.constant 0 : index
    %c0_20 = arith.constant 0 : index
    %42 = vector.load %arg6[%c0_19, %c0_20] : memref<1x128xf32, #tpu.memory_space<vmem>>, vector<1x128xf32>
    %43 = vector.broadcast %42 : vector<1x128xf32> to vector<72x128xf32>
    %44 = arith.addf %41, %43 : vector<72x128xf32>
    %45 = arith.truncf %44 : vector<72x128xf32> to vector<72x128xbf16>
    %c0_21 = arith.constant 0 : index
    %c0_22 = arith.constant 0 : index
    %c0_23 = arith.constant 0 : index
    %46 = vector.load %arg7[%c0_21, %c0_22, %c0_23] : memref<1x72x128xbf16, #tpu.memory_space<vmem>>, vector<1x72x128xbf16>
    %47 = vector.shape_cast %46 : vector<1x72x128xbf16> to vector<72x128xbf16>
    %48 = vector.shape_cast %45 : vector<72x128xbf16> to vector<1x72x128xbf16>
    tpu.vector_store %arg7[%c0_21, %c0_22, %c0_23], %48 {strides = array<i32>} : memref<1x72x128xbf16, #tpu.memory_space<vmem>>, vector<1x72x128xbf16>,
    return
  }
  func.func @transform_0(%arg0: i32, %arg1: i32) -> (i32, i32, i32, i32) {
    %c0_i32 = arith.constant 0 : i32
    %c0_i32_0 = arith.constant 0 : i32
    %c0_i32_1 = arith.constant 0 : i32
    %c0_i32_2 = arith.constant 0 : i32
    return %arg0, %c0_i32, %c0_i32_0, %c0_i32_1 : i32, i32, i32, i32
  }
  func.func @transform_1(%arg0: i32, %arg1: i32) -> (i32, i32) {
    %c0_i32 = arith.constant 0 : i32
    %c0_i32_0 = arith.constant 0 : i32
    %c0_i32_1 = arith.constant 0 : i32
    return %c0_i32, %c0_i32_0 : i32, i32
  }
  func.func @transform_2(%arg0: i32, %arg1: i32) -> (i32, i32) {
    %c0_i32 = arith.constant 0 : i32
    %c0_i32_0 = arith.constant 0 : i32
    %c0_i32_1 = arith.constant 0 : i32
    return %c0_i32, %c0_i32_0 : i32, i32
  }
  func.func @transform_3(%arg0: i32, %arg1: i32) -> (i32, i32) {
    %c0_i32 = arith.constant 0 : i32
    %c0_i32_0 = arith.constant 0 : i32
    %c0_i32_1 = arith.constant 0 : i32
    return %c0_i32, %c0_i32_0 : i32, i32
  }
  func.func @transform_4(%arg0: i32, %arg1: i32) -> (i32, i32) {
    %c0_i32 = arith.constant 0 : i32
    %c0_i32_0 = arith.constant 0 : i32
    %c0_i32_1 = arith.constant 0 : i32
    return %c0_i32, %c0_i32_0 : i32, i32
  }
  func.func @transform_5(%arg0: i32, %arg1: i32) -> (i32, i32, i32) {
    %c0_i32 = arith.constant 0 : i32
    %c0_i32_0 = arith.constant 0 : i32
    return %arg0, %arg1, %c0_i32 : i32, i32, i32
  }
  func.func @transform_6(%arg0: i32, %arg1: i32) -> (i32, i32, i32) {
    %c0_i32 = arith.constant 0 : i32
    %c0_i32_0 = arith.constant 0 : i32
    return %arg0, %arg1, %c0_i32 : i32, i32, i32
  }
}

module attributes {stable_mosaic.version = 11 : i64} {
  func.func @_kernel_head_only(%arg0: i32, %arg1: i32, %arg2: memref<1x4x32x16xbf16, #tpu.memory_space<vmem>>, %arg3: memref<144x32xbf16, #tpu.memory_space<vmem>>, %arg4: memref<1x32xf32, #tpu.memory_space<vmem>>, %arg5: memref<32x128xbf16, #tpu.memory_space<vmem>>, %arg6: memref<1x128xf32, #tpu.memory_space<vmem>>, %arg7: memref<1x24x128xbf16, #tpu.memory_space<vmem>>) attributes {dimension_semantics = [#tpu.dimension_semantics<parallel>, #tpu.dimension_semantics<parallel>], iteration_bounds = array<i64: 2, 1>, scalar_prefetch = 0 : i64, scratch_operands = 0 : i64, tpu.core_type = #tpu.core_type<tc>, window_params = [{transform_indices = @transform_0, window_bounds = array<i64: 1, 4, 32, 16>}, {pipeline_mode = #tpu.pipeline_mode<synchronous>, transform_indices = @transform_1, window_bounds = array<i64: 144, 32>}, {pipeline_mode = #tpu.pipeline_mode<synchronous>, transform_indices = @transform_2, window_bounds = array<i64: 1, 32>}, {pipeline_mode = #tpu.pipeline_mode<synchronous>, transform_indices = @transform_3, window_bounds = array<i64: 32, 128>}, {pipeline_mode = #tpu.pipeline_mode<synchronous>, transform_indices = @transform_4, window_bounds = array<i64: 1, 128>}, {transform_indices = @transform_5, window_bounds = array<i64: 1, 24, 128>}]} {
    %c24_i32 = arith.constant 24 : i32
    %0 = arith.muli %arg1, %c24_i32 : i32
    %1 = tpu.assume_multiple %0, 8 : i32
    %c0 = arith.constant 0 : index
    %c0_0 = arith.constant 0 : index
    %2 = arith.index_cast %1 : i32 to index
    %c0_1 = arith.constant 0 : index
    %3 = vector.load %arg2[%c0, %c0_0, %2, %c0_1] : memref<1x4x32x16xbf16, #tpu.memory_space<vmem>>, vector<1x1x32x16xbf16>
    %4 = vector.shape_cast %3 : vector<1x1x32x16xbf16> to vector<32x16xbf16>
    %c0_2 = arith.constant 0 : index
    %c1 = arith.constant 1 : index
    %5 = arith.index_cast %1 : i32 to index
    %c0_3 = arith.constant 0 : index
    %6 = vector.load %arg2[%c0_2, %c1, %5, %c0_3] : memref<1x4x32x16xbf16, #tpu.memory_space<vmem>>, vector<1x1x32x16xbf16>
    %7 = vector.shape_cast %6 : vector<1x1x32x16xbf16> to vector<32x16xbf16>
    %c0_4 = arith.constant 0 : index
    %c2 = arith.constant 2 : index
    %8 = arith.index_cast %1 : i32 to index
    %c0_5 = arith.constant 0 : index
    %9 = vector.load %arg2[%c0_4, %c2, %8, %c0_5] : memref<1x4x32x16xbf16, #tpu.memory_space<vmem>>, vector<1x1x32x16xbf16>
    %10 = vector.shape_cast %9 : vector<1x1x32x16xbf16> to vector<32x16xbf16>
    %c0_6 = arith.constant 0 : index
    %c3 = arith.constant 3 : index
    %11 = arith.index_cast %1 : i32 to index
    %c0_7 = arith.constant 0 : index
    %12 = vector.load %arg2[%c0_6, %c3, %11, %c0_7] : memref<1x4x32x16xbf16, #tpu.memory_space<vmem>>, vector<1x1x32x16xbf16>
    %13 = vector.shape_cast %12 : vector<1x1x32x16xbf16> to vector<32x16xbf16>
    %14 = vector.extract_strided_slice %4 {offsets = [0, 0], sizes = [24, 16], strides = [1, 1]} : vector<32x16xbf16> to vector<24x16xbf16>
    %15 = vector.extract_strided_slice %7 {offsets = [0, 0], sizes = [24, 16], strides = [1, 1]} : vector<32x16xbf16> to vector<24x16xbf16>
    %16 = vector.extract_strided_slice %4 {offsets = [1, 0], sizes = [24, 16], strides = [1, 1]} : vector<32x16xbf16> to vector<24x16xbf16>
    %17 = vector.extract_strided_slice %10 {offsets = [0, 0], sizes = [24, 16], strides = [1, 1]} : vector<32x16xbf16> to vector<24x16xbf16>
    %18 = vector.extract_strided_slice %13 {offsets = [0, 0], sizes = [24, 16], strides = [1, 1]} : vector<32x16xbf16> to vector<24x16xbf16>
    %19 = vector.extract_strided_slice %10 {offsets = [1, 0], sizes = [24, 16], strides = [1, 1]} : vector<32x16xbf16> to vector<24x16xbf16>
    %20 = vector.extract_strided_slice %4 {offsets = [5, 0], sizes = [24, 16], strides = [1, 1]} : vector<32x16xbf16> to vector<24x16xbf16>
    %21 = vector.extract_strided_slice %7 {offsets = [5, 0], sizes = [24, 16], strides = [1, 1]} : vector<32x16xbf16> to vector<24x16xbf16>
    %22 = vector.extract_strided_slice %4 {offsets = [6, 0], sizes = [24, 16], strides = [1, 1]} : vector<32x16xbf16> to vector<24x16xbf16>
    %23 = tpu.concatenate %14, %15, %16, %17, %18, %19, %20, %21, %22 in 1 : vector<24x16xbf16>, vector<24x16xbf16>, vector<24x16xbf16>, vector<24x16xbf16>, vector<24x16xbf16>, vector<24x16xbf16>, vector<24x16xbf16>, vector<24x16xbf16>, vector<24x16xbf16> -> vector<24x144xbf16>
    %c0_8 = arith.constant 0 : index
    %c0_9 = arith.constant 0 : index
    %24 = vector.load %arg3[%c0_8, %c0_9] : memref<144x32xbf16, #tpu.memory_space<vmem>>, vector<144x32xbf16>
    %cst = arith.constant dense<0.000000e+00> : vector<24x32xf32>
    %25 = tpu.matmul %23, %24, %cst {dimension_numbers = #tpu.dot_dimension_numbers<[1], [0], [0], [1], [0, 0, 1, 1], [], []>} : vector<24x144xbf16>, vector<144x32xbf16>, vector<24x32xf32> -> vector<24x32xf32>
    %c0_10 = arith.constant 0 : index
    %c0_11 = arith.constant 0 : index
    %26 = vector.load %arg4[%c0_10, %c0_11] : memref<1x32xf32, #tpu.memory_space<vmem>>, vector<1x32xf32>
    %27 = vector.broadcast %26 : vector<1x32xf32> to vector<24x32xf32>
    %28 = arith.addf %25, %27 : vector<24x32xf32>
    %29 = arith.negf %28 : vector<24x32xf32>
    %30 = math.exp %29 : vector<24x32xf32>
    %cst_12 = arith.constant 1.000000e+00 : f32
    %31 = vector.broadcast %cst_12 : f32 to vector<24x32xf32>
    %32 = arith.addf %31, %30 : vector<24x32xf32>
    %33 = arith.divf %31, %32 : vector<24x32xf32>
    %34 = arith.mulf %28, %33 : vector<24x32xf32>
    %35 = arith.truncf %34 : vector<24x32xf32> to vector<24x32xbf16>
    %c0_13 = arith.constant 0 : index
    %c0_14 = arith.constant 0 : index
    %36 = vector.load %arg5[%c0_13, %c0_14] : memref<32x128xbf16, #tpu.memory_space<vmem>>, vector<32x128xbf16>
    %cst_15 = arith.constant dense<0.000000e+00> : vector<24x128xf32>
    %37 = tpu.matmul %35, %36, %cst_15 {dimension_numbers = #tpu.dot_dimension_numbers<[1], [0], [0], [1], [0, 0, 1, 1], [], []>} : vector<24x32xbf16>, vector<32x128xbf16>, vector<24x128xf32> -> vector<24x128xf32>
    %c0_16 = arith.constant 0 : index
    %c0_17 = arith.constant 0 : index
    %38 = vector.load %arg6[%c0_16, %c0_17] : memref<1x128xf32, #tpu.memory_space<vmem>>, vector<1x128xf32>
    %39 = vector.broadcast %38 : vector<1x128xf32> to vector<24x128xf32>
    %40 = arith.addf %37, %39 : vector<24x128xf32>
    %41 = arith.truncf %40 : vector<24x128xf32> to vector<24x128xbf16>
    %c0_18 = arith.constant 0 : index
    %c0_19 = arith.constant 0 : index
    %c0_20 = arith.constant 0 : index
    %42 = vector.load %arg7[%c0_18, %c0_19, %c0_20] : memref<1x24x128xbf16, #tpu.memory_space<vmem>>, vector<1x24x128xbf16>
    %43 = vector.shape_cast %42 : vector<1x24x128xbf16> to vector<24x128xbf16>
    %44 = vector.shape_cast %41 : vector<24x128xbf16> to vector<1x24x128xbf16>
    tpu.vector_store %arg7[%c0_18, %c0_19, %c0_20], %44 {strides = array<i32>} : memref<1x24x128xbf16, #tpu.memory_space<vmem>>, vector<1x24x128xbf16>,
    return
  }
  func.func @transform_0(%arg0: i32, %arg1: i32) -> (i32, i32, i32, i32) {
    %c0_i32 = arith.constant 0 : i32
    %c0_i32_0 = arith.constant 0 : i32
    %c0_i32_1 = arith.constant 0 : i32
    %c0_i32_2 = arith.constant 0 : i32
    return %arg0, %c0_i32, %c0_i32_0, %c0_i32_1 : i32, i32, i32, i32
  }
  func.func @transform_1(%arg0: i32, %arg1: i32) -> (i32, i32) {
    %c0_i32 = arith.constant 0 : i32
    %c0_i32_0 = arith.constant 0 : i32
    %c0_i32_1 = arith.constant 0 : i32
    return %c0_i32, %c0_i32_0 : i32, i32
  }
  func.func @transform_2(%arg0: i32, %arg1: i32) -> (i32, i32) {
    %c0_i32 = arith.constant 0 : i32
    %c0_i32_0 = arith.constant 0 : i32
    %c0_i32_1 = arith.constant 0 : i32
    return %c0_i32, %c0_i32_0 : i32, i32
  }
  func.func @transform_3(%arg0: i32, %arg1: i32) -> (i32, i32) {
    %c0_i32 = arith.constant 0 : i32
    %c0_i32_0 = arith.constant 0 : i32
    %c0_i32_1 = arith.constant 0 : i32
    return %c0_i32, %c0_i32_0 : i32, i32
  }
  func.func @transform_4(%arg0: i32, %arg1: i32) -> (i32, i32) {
    %c0_i32 = arith.constant 0 : i32
    %c0_i32_0 = arith.constant 0 : i32
    %c0_i32_1 = arith.constant 0 : i32
    return %c0_i32, %c0_i32_0 : i32, i32
  }
  func.func @transform_5(%arg0: i32, %arg1: i32) -> (i32, i32, i32) {
    %c0_i32 = arith.constant 0 : i32
    %c0_i32_0 = arith.constant 0 : i32
    return %arg0, %arg1, %c0_i32 : i32, i32, i32
  }
}

</mosaic_0001>

<bundles_post_ra>
// kernel: yolov8_security_forward.2
= control target key start
LH: loop header
LB: loop body
LE: loop exit
PB: predicated region body
PF: predicated region fallthrough
CT: control target
= control target key end

     0   :  { %s1740_s21 = smov 0   ;;  %s1742_s22 = smov 0   ;;  %s2105_s0 = inlined_call_operand.vmem [shape: bf16[2,4,88,8], index: 0, kind: input, shape index: {}]   ;;  %s2106_s1 = inlined_call_operand.vmem [shape: bf16[72,16], index: 1, kind: input, shape index: {}]   ;;  %s2107_s2 = inlined_call_operand.vmem [shape: f32[1,16], index: 2, kind: input, shape index: {}]   ;;  %s2108_s3 = inlined_call_operand.vmem [shape: bf16[16,128], index: 3, kind: input, shape index: {}]   ;;  %s2109_s4 = inlined_call_operand.vmem [shape: f32[1,128], index: 4, kind: input, shape index: {}]   ;;  %s2110_s5 = inlined_call_operand.vmem [shape: bf16[2,72,128], index: 5, kind: output, shape index: {0}]   ;;  %s2111_s6 = inlined_call_operand.vmem [shape: bf16[2,72,16], index: 6, kind: output, shape index: {1}]  }
   0x1   :  { %s1744_s23 = smov 0  }
   0x2 LB: > { %s29_s24 = sadd.s32 1, %s1689_s22  ;;  %p1339_p0 = scmp.ge.s32.totalorder %s1693_s23, 1  ;;  %s1693_s23 = sphi %s1744_s23, %s17_s23   ;;  %s1689_s22 = sphi %s1742_s22, %s2113_s22   ;;  %s1685_s21 = sphi %s1740_s21, %s2112_s21  }
   0x3   : > { %p31_p1 = scmp.ge.s32.totalorder %s29_s24, 2  ;;  %p231_p2 = scmp.lt.s32.totalorder %s1693_s23, 3 }
   0x5   : > { %s2115_s24 = smov (%p31_p1, %s29_s24), 0  ;;  %p232_p3 = pnand %p1339_p0, %p231_p2 }
   0x6   : > { %p274_p4 = scmp.lt.s32.totalorder (!%p232_p3), %s1685_s21, 1  ;;  %v1695_v0 = vmov (!%p232_p3), 0.0   ;;  %v1628_v1 = vld [vmem:[%s2106_s1] sm:$0xff] (!%p232_p3)   ;;  %v1629_v2 = vld [vmem:[%s2106_s1 + $0x8] sm:$0xff] (!%p232_p3)   ;;  %vm696_vm0 = vcmask (!%p232_p3), 1046528   ;;  %v1630_v3 = vld [vmem:[%s2106_s1 + $0x10] sm:$0xff] (!%p232_p3)  }
   0x7   : > { %235 = sbr.rel (%p232_p3) target bundleno = 678 (0x2a6), region = 40  ;;  %1509 = vmatprep.subr.bf16.mxu0 (!%p232_p3), %v1695_v0  ;;  %1539 = vmatprep.subr.bf16.mxu1 (!%p232_p3), %v1695_v0  ;;  %s1696_s11 = smov (!%p232_p3), 24   ;;  %vm414_vm1 = vsmask.f32 (!%p232_p3), 7424  ;;  %vm859_vm2 = vcmask (!%p232_p3), 1043456   ;;  %vm1704_vm3 = vmmov (!%p232_p3), 0  }
   0x8   : > { %1510 = vmatpush3.bf16.msra.mxu0 (!%p232_p3), %v1628_v1  ;;  %s1697_s12 = smov (!%p232_p3), 8   ;;  %s1698_s13 = smov (!%p232_p3), 32   ;;  %1519 = vmatprep.mubr.msk.bf16.mxu0 (!%p232_p3), %vm1704_vm3, %v1695_v0  ;;  %vm716_vm4 = vcmask (!%p232_p3), 64512   ;;  %vm728_vm5 = vcmask (!%p232_p3), 130048   ;;  %vm739_vm6 = vcmask (!%p232_p3), 195584   ;;  %vm750_vm7 = vcmask (!%p232_p3), 261120  }
   0x9   : > { %1511 = vmatprep.subr.bf16.mxu0 (!%p232_p3), %v1695_v0  ;;  %s1699_s14 = smov (!%p232_p3), 64   ;;  %s1700_s15 = smov (!%p232_p3), 16   ;;  %1541 = vmatprep.mubr.msk.bf16.mxu1 (!%p232_p3), %vm1704_vm3, %v1695_v0  ;;  %vm761_vm8 = vcmask (!%p232_p3), 326656   ;;  %vm772_vm9 = vcmask (!%p232_p3), 392192   ;;  %vm783_vm10 = vcmask (!%p232_p3), 457728   ;;  %vm794_vm11 = vcmask (!%p232_p3), 523264  }
   0xa   : > { %s1701_s16 = smov (!%p232_p3), 48   ;;  %s1702_s17 = smov (!%p232_p3), 40   ;;  %vm848_vm12 = vcmask (!%p232_p3), 588800   ;;  %vm1035_vm13 = vcmask (!%p232_p3), 125952  }
   0xb   : > { %s1703_s20 = smov (!%p232_p3), 56  }
   0xc   : > { %1512 = vmatpush3.bf16.msra.mxu0 (!%p232_p3), %v1629_v2 }
   0xd   : > { %1513 = vmatprep.subr.bf16.mxu0 (!%p232_p3), %v1695_v0 }
   0xe   : > { %s2117_s21 = smov (!%p274_p4, %s1685_s21), 1 }
   0xf   : > { %s1561_s27 = smul.u32 176, %s2117_s21 }
  0x10   : > { %1514 = vmatpush3.bf16.msra.mxu0 %v1630_v3  ;;  %s1562_s7 = smul.u32 36, %s2117_s21 }
  0x11   : > { %s1773_s8 = scalar_lea.vmem %s2105_s0, %s1561_s27  ;;  %1515 = vmatprep.subr.bf16.mxu0 %v1695_v0 }
  0x12   : > { %v1597_v4 = vld [vmem:[%s1773_s8 + $0x58] sm:$0xff]   ;;  %v1343_v5 = vld [vmem:[%s1773_s8 + $0x2c] sm:$0xf]  ;;  %v1344_v6 = vld [vmem:[%s1773_s8 + $0x30] sm:$0xf]  ;;  %s2044_s10 = scalar_lea.vmem %s2111_s6, %s1562_s7 }
  0x13   : > { %v1345_v7 = vld [vmem:[%s1773_s8 + $0x34] sm:$0xf]  ;;  %487 = vrot.lane.b32.xlu1 %v1597_v4, %s1696_s11  ;;  %v1378_v8 = vcombine.low %v1343_v5, %v1344_v6  ;;  %v1600_v10 = vld [vmem:[%s1773_s8 + $0x84] sm:$0xff]   ;;  %v1346_v11 = vld [vmem:[%s1773_s8 + $0x38] sm:$0xf]  ;;  %v536_v14 = vshll.u32 %v1597_v4, 16 }
  0x14   : > { %v1783_v9 = vcombine.low %v1344_v6, %v1345_v7  ;;  %v1789_v12 = vld [vmem:[%s1773_s8 + $0x3c] sm:$0xf]  ;;  %v306_v13 = vld [vmem:[%s1773_s8 + $0x4] sm:$0xf]  ;;  %v1379_v16 = vcombine.low %v1345_v7, %v1346_v11  ;;  %v307_v17 = vld [vmem:[%s1773_s8 + $0x8] sm:$0xf] }
  0x15   : > { %401 = vrot.lane.b32.xlu0 %v1378_v8, %s1697_s12  ;;  %v308_v18 = vld [vmem:[%s1773_s8 + $0xc] sm:$0xf]  ;;  %v309_v19 = vld [vmem:[%s1773_s8 + $0x10] sm:$0xf]  ;;  %v1395_v20 = vcombine.low %v306_v13, %v307_v17  ;;  %v305_v21 = vld [vmem:[%s1773_s8] sm:$0xf]  ;;  %v1803_v24 = vcombine.low %v1346_v11, %v1789_v12 }
  0x16   : > { %v648_v15 = vshrl.u32 %v1783_v9, 16  ;;  %v1798_v22 = vcombine.low %v307_v17, %v308_v18  ;;  %v650_v23 = vshll.u32 %v1783_v9, 16  ;;  %v1805_v25 = vcombine.low %v308_v18, %v309_v19  ;;  %v1810_v27 = vld [vmem:[%s1773_s8 + $0x60] sm:$0xff]   ;;  %v310_v32 = vld [vmem:[%s1773_s8 + $0x14] sm:$0xf]  ;;  %v1836_v61 = vld [vmem:[%s1773_s8 + $0x68] sm:$0xff]  }
  0x17   : > { %520 = vrot.lane.b32.xlu1 %v1600_v10, %s1698_s13  ;;  %v1807_v26 = vcombine.low %v305_v21, %v306_v13  ;;  %v697_v28 = vrot.slane %v1395_v20, 1  ;;  %v590_v30 = vshrl.u32 %v1395_v20, 16  ;;  %v592_v31 = vshll.u32 %v1395_v20, 16  ;;  %v311_v53 = vld [vmem:[%s1773_s8 + $0x18] sm:$0xf]  ;;  %v1609_v7 = vld [vmem:[%s1773_s8 + $0x8c] sm:$0xff]  }
  0x18   : > { %v423_v29 = vshll.u32 %v1798_v22, 16  ;;  %v698_v33 = vrot.slane %v1805_v25, 1  ;;  %v597_v36 = vshll.u32 %v1805_v25, 16  ;;  %v534_v39 = vshrl.u32 %v1597_v4, 16  ;;  %v1843_v2 = vld [vmem:[%s1773_s8 + $0x40] sm:$0xf] }
  0x19   : > { %403 = vrot.lane.b32.xlu0 %v1379_v16, %s1697_s12  ;;  %v416_v34 = vshrl.u32 %v1807_v26, 16  ;;  %v418_v35 = vshll.u32 %v1807_v26, 16  ;;  %v594_v38 = vrot.slane %v592_v31, 1  ;;  %v538_v40 = vrot.slane %v536_v14, 1  ;;  %v1848_v5 = vld [vmem:[%s1773_s8 + $0x44] sm:$0xf] }
  0x1a   : > { %v425_v37 = vrot.slane %v423_v29, 1  ;;  %v699_v41 = vsel %vm696_vm0, %v697_v28, %v698_v33  ;;  %v599_v43 = vrot.slane %v597_v36, 1  ;;  %v541_v44 = vshll.u32 %v1810_v27, 16  ;;  %v312_v6 = vld [vmem:[%s1773_s8 + $0x1c] sm:$0xf] }
  0x1b   : > { %v420_v42 = vrot.slane %v418_v35, 1  ;;  %v652_v45 = vrot.slane %v650_v23, 1  ;;  %706 = vrot.lane.b32.xlu1 %v699_v41, %s1699_s14  ;;  %v595_v46 = vor.u32 %v594_v38, %v590_v30  ;;  %v1825_v47 = vcombine.low %v309_v19, %v310_v32  ;;  %v1631_v11 = vld [vmem:[%s2106_s1 + $0x18] sm:$0xff]   ;;  %v1899_v41 = vld [vmem:[%s1773_s8 + $0x4c] sm:$0xf] }
  0x1c   : > { %v427_v48 = vshrl.u32 %v1798_v22, 16  ;;  %v539_v50 = vor.u32 %v538_v40, %v534_v39  ;;  %v543_v51 = vrot.slane %v541_v44, 1  ;;  %v655_v52 = vshll.u32 %v1803_v24, 16  ;;  %1516 = vmatpush3.bf16.msra.mxu0 %v1631_v11  ;;  %v1350_v39 = vld [vmem:[%s1773_s8 + $0x48] sm:$0xf] }
  0x1d   : > { %v421_v49 = vor.u32 %v420_v42, %v416_v34  ;;  %v600_v54 = vsel %vm414_vm1, %v595_v46, %v599_v43  ;;  %v431_v56 = vshll.u32 %v1825_v47, 16  ;;  %v653_v59 = vor.u32 %v652_v45, %v648_v15  ;;  %1517 = vmatprep.subr.bf16.mxu0 %v1695_v0  ;;  %v1632_v42 = vld [vmem:[%s2106_s1 + $0x20] ss:$0 sps:$4 sm:$0xff]   ;;  %v1615_v46 = vld [vmem:[%s1773_s8 + $0x94] sm:$0xff]  }
  0x1e   : > { %v429_v55 = vor.u32 %v427_v48, %v425_v37  ;;  %v657_v60 = vrot.slane %v655_v52, 1  ;;  %v1838_v62 = vcombine.low %v310_v32, %v311_v53  ;;  %v544_v63 = vsel %vm414_vm1, %v539_v50, %v543_v51 }
  0x1f   : > { %v426_v57 = vsel %vm414_vm1, %v421_v49, %v425_v37  ;;  %628 = vrot.lane.b32.xlu1 %v600_v54, %s1701_s16  ;;  %v433_v58 = vrot.slane %v431_v56, 1  ;;  %v601_v1 = vshrl.u32 %v1805_v25, 16  ;;  %v545_v9 = vshrl.u32 %v1810_v27, 16 }
  0x20   : > { %454 = vrot.lane.b32.xlu0 %v426_v57, %s1700_s15  ;;  %v605_v4 = vshll.u32 %v1838_v62, 16  ;;  %v658_v8 = vsel %vm414_vm1, %v653_v59, %v657_v60  ;;  %v549_v10 = vshll.u32 %v1836_v61, 16  ;;  %v1862_v15 = vcombine.low %v1843_v2, %v1848_v5 }
  0x21   : > { %v434_v3 = vsel %vm414_vm1, %v429_v55, %v433_v58  ;;  %v603_v13 = vor.u32 %v601_v1, %v599_v43  ;;  %v1864_v16 = vcombine.low %v311_v53, %v312_v6  ;;  %v659_v17 = vshrl.u32 %v1803_v24, 16  ;;  %v1876_v24 = vld [vmem:[%s1773_s8 + $0x20] sm:$0xf]  ;;  %v314_v43 = vld [vmem:[%s1773_s8 + $0x24] sm:$0xf] }
  0x22   : > { %v607_v14 = vrot.slane %v605_v4, 1  ;;  %v547_v18 = vor.u32 %v545_v9, %v543_v51  ;;  %v551_v19 = vrot.slane %v549_v10, 1  ;;  %v700_v20 = vrot.slane %v1838_v62, 1  ;;  %v1363_v9 = vld [vmem:[%s1773_s8 + $0x7c] sm:$0xf] }
  0x23   : > { %456 = vrot.lane.b32.xlu1 %v434_v3, %s1700_s15  ;;  %v663_v23 = vshll.u32 %v1862_v15, 16  ;;  %v435_v28 = vshrl.u32 %v1825_v47, 16  ;;  %v439_v29 = vshll.u32 %v1864_v16, 16  ;;  %v661_v31 = vor.u32 %v659_v17, %v657_v60  ;;  %v1622_v17 = vld [vmem:[%s1773_s8 + $0x9c] sm:$0xff]  }
  0x24   : > { %572 = vrot.lane.b32.xlu0 %v544_v63, %s1702_s17  ;;  %v608_v21 = vsel %vm414_vm1, %v603_v13, %v607_v14  ;;  %v552_v30 = vsel %vm414_vm1, %v547_v18, %v551_v19  ;;  %v701_v32 = vsel %vm696_vm0, %v698_v33, %v700_v20  ;;  %v1886_v37 = vcombine.low %v312_v6, %v1876_v24 }
  0x25   : > { %v665_v34 = vrot.slane %v663_v23, 1  ;;  %v437_v35 = vor.u32 %v435_v28, %v433_v58  ;;  %v441_v36 = vrot.slane %v439_v29, 1  ;;  %v609_v38 = vshrl.u32 %v1838_v62, 16  ;;  %v315_v62 = vld [vmem:[%s1773_s8 + $0x28] sm:$0xf]  ;;  %v1624_v23 = vld [vmem:[%s1773_s8 + $0x50] sm:$0xff]  }
  0x26   : > { %v613_v40 = vshll.u32 %v1886_v37, 16  ;;  %v1380_v44 = vcombine.low %v1789_v12, %v1843_v2  ;;  %v553_v45 = vshrl.u32 %v1836_v61, 16  ;;  %v1403_v50 = vcombine.low %v1350_v39, %v1899_v41 }
  0x27   : > { %522 = vrot.lane.b32.xlu1 %v1609_v7, %s1698_s13  ;;  %v666_v25 = vsel %vm414_vm1, %v661_v31, %v665_v34  ;;  %v442_v33 = vsel %vm414_vm1, %v437_v35, %v441_v36  ;;  %v611_v49 = vor.u32 %v609_v38, %v607_v14  ;;  %v1383_v52 = vcombine.low %v1876_v24, %v314_v43 }
  0x28   : > { %686 = vrot.lane.b32.xlu0 %v658_v8, %s1703_s20  ;;  %v615_v51 = vrot.slane %v613_v40, 1  ;;  %v861_v53 = vsel %vm859_vm2, %v1632_v42, 0  ;;  %v555_v12 = vor.u32 %v553_v45, %v551_v19  ;;  %v667_v55 = vshrl.u32 %v1862_v15, 16  ;;  %v1362_v8 = vld [vmem:[%s1773_s8 + $0x78] sm:$0xf] }
  0x29   : > { %1518 = vmatpush3.bf16.msra.mxu0 %v861_v53  ;;  %v702_v56 = vrot.slane %v1886_v37, 1  ;;  %v671_v58 = vshll.u32 %v1403_v50, 16  ;;  %v443_v59 = vshrl.u32 %v1864_v16, 16  ;;  %v447_v60 = vshll.u32 %v1383_v52, 16 }
  0x2a   : > { %v616_v57 = vsel %vm414_vm1, %v611_v49, %v615_v51  ;;  %v669_v1 = vor.u32 %v667_v55, %v665_v34  ;;  %v1399_v7 = vcombine.low %v314_v43, %v315_v62  ;;  %v617_v13 = vshrl.u32 %v1886_v37, 16 }
  0x2b   : > { %630 = vrot.lane.b32.xlu1 %v608_v21, %s1701_s16  ;;  %v703_v2 = vsel %vm696_vm0, %v700_v20, %v702_v56  ;;  %v673_v3 = vrot.slane %v671_v58, 1  ;;  %v445_v4 = vor.u32 %v443_v59, %v441_v36  ;;  %v449_v6 = vrot.slane %v447_v60, 1 }
  0x2c   : > { %489 = vrot.lane.b32.xlu0 %v1810_v27, %s1696_s11  ;;  %v1891_v27 = vld [vmem:[%s1773_s8 + $0x70] sm:$0xff]   ;;  %v621_v14 = vshll.u32 %v1399_v7, 16  ;;  %v1381_v15 = vcombine.low %v1848_v5, %v1350_v39  ;;  %v619_v20 = vor.u32 %v617_v13, %v615_v51  ;;  %v675_v29 = vshrl.u32 %v1403_v50, 16 }
  0x2d   : > { %v557_v48 = vshll.u32 %v1891_v27, 16  ;;  %v674_v10 = vsel %vm414_vm1, %v669_v1, %v673_v3  ;;  %v450_v11 = vsel %vm414_vm1, %v445_v4, %v449_v6  ;;  %v561_v18 = vshrl.u32 %v1891_v27, 16 }
  0x2e   : > { %v623_v21 = vrot.slane %v621_v14, 1  ;;  %v704_v5 = vrot.slane %v1399_v7, 1  ;;  %v451_v34 = vshrl.u32 %v1383_v52, 16  ;;  %v677_v36 = vor.u32 %v675_v29, %v673_v3 }
  0x2f   : > { %708 = vrot.lane.b32.xlu1 %v701_v32, %s1699_s14  ;;  %v559_v54 = vrot.slane %v557_v48, 1  ;;  %v679_v32 = vshll.u32 %v1624_v23, 16  ;;  %v625_v40 = vshrl.u32 %v1399_v7, 16  ;;  %v1388_v42 = vcombine.low %v1362_v8, %v1362_v8 }
  0x30   : > { %574 = vrot.lane.b32.xlu0 %v552_v30, %s1702_s17  ;;  %v624_v31 = vsel %vm414_vm1, %v619_v20, %v623_v21  ;;  %v705_v38 = vsel %vm696_vm0, %v702_v56, %v704_v5  ;;  %v453_v39 = vor.u32 %v451_v34, %v449_v6 }
  0x31   : > { %v560_v63 = vsel %vm414_vm1, %v555_v12, %v559_v54  ;;  %v563_v28 = vor.u32 %v561_v18, %v559_v54  ;;  %v681_v37 = vrot.slane %v679_v32, 1 }
  0x33   : > { %458 = vrot.lane.b32.xlu1 %v442_v33, %s1700_s15  ;;  %v1627_v33 = vld [vmem:[%s1773_s8 + $0xa4] ss:$0 sps:$4 sm:$0xff]  }
  0x34   : > { %688 = vrot.lane.b32.xlu0 %v666_v25, %s1703_s20  ;;  %v682_v25 = vsel %vm414_vm1, %v677_v36, %v681_v37 }
  0x37   : > { %524 = vrot.lane.b32.xlu1 %v1615_v46, %s1698_s13  ;;  %v683_v46 = vshrl.u32 %v1624_v23, 16 }
  0x38   : > { %405 = vrot.lane.b32.xlu0 %v1380_v44, %s1697_s12  ;;  %v627_v44 = vor.u32 %v625_v40, %v623_v21 }
  0x3b   : > { %632 = vrot.lane.b32.xlu1 %v616_v57, %s1701_s16 }
  0x3c   : > { %491 = vrot.lane.b32.xlu0 %v1836_v61, %s1696_s11  ;;  %v1394_v61 = vcombine.low %v1362_v8, %v1363_v9 }
  0x3e   : > { %v565_v19 = vshll.u32 %v1394_v61, 16  ;;  %v569_v43 = vshrl.u32 %v1394_v61, 16 }
  0x3f   : > { %710 = vrot.lane.b32.xlu1 %v703_v2, %s1699_s14 }
  0x40   : > { %576 = vrot.lane.b32.xlu0 %v560_v63, %s1702_s17  ;;  %v567_v30 = vrot.slane %v565_v19, 1 }
  0x42   : > { %v568_v35 = vsel %vm414_vm1, %v563_v28, %v567_v30  ;;  %v571_v45 = vor.u32 %v569_v43, %v567_v30 }
  0x43   : > { %460 = vrot.lane.b32.xlu1 %v450_v11, %s1700_s15 }
  0x44   : > { %690 = vrot.lane.b32.xlu0 %v674_v10, %s1703_s20 }
  0x47   : > { %526 = vrot.lane.b32.xlu1 %v1622_v17, %s1698_s13 }
  0x48   : > { %407 = vrot.lane.b32.xlu0 %v1381_v15, %s1697_s12 }
  0x4b   : > { %634 = vrot.lane.b32.xlu1 %v624_v31, %s1701_s16 }
  0x4c   : > { %493 = vrot.lane.b32.xlu0 %v1891_v27, %s1696_s11  ;;  %v1382_v27 = vcombine.low %v1899_v41, %v1899_v41  ;;  %v685_v41 = vor.u32 %v683_v46, %v681_v37 }
  0x4f   : > { %712 = vrot.lane.b32.xlu1 %v705_v38, %s1699_s14 }
  0x50   : > { %578 = vrot.lane.b32.xlu0 %v568_v35, %s1702_s17 }
  0x53   : > { %462 = vrot.lane.b32.xlu1 %v453_v39, %s1700_s15  ;;  %s2089_s15 = scalar_lea.vmem %s2110_s5, %s1562_s7 }
  0x54   : > { %692 = vrot.lane.b32.xlu0 %v682_v25, %s1703_s20 }
  0x57   : > { %528 = vrot.lane.b32.xlu1 %v1627_v33, %s1698_s13 }
  0x58   : > { %409 = vrot.lane.b32.xlu0 %v1382_v27, %s1697_s12 }
  0x5b   : > { %636 = vrot.lane.b32.xlu1 %v627_v44, %s1701_s16 }
  0x5c   : > { %495 = vrot.lane.b32.xlu0 %v1388_v42, %s1696_s11 }
  0x5f   : > { %714 = vrot.lane.b32.xlu1 %v704_v5, %s1699_s14 }
  0x60   : > { %580 = vrot.lane.b32.xlu0 %v571_v45, %s1702_s17 }
  0x64   : > { %694 = vrot.lane.b32.xlu0 %v685_v41, %s1703_s20 }
  0x85   : > { %v488_v48 = vpop.permute.xlu1 %487 }
  0x87   : > { %v402_v49 = vpop.permute.xlu0 %401 }
  0x88   : > { %v718_v53 = vsel %vm716_vm4, %v1807_v26, %v402_v49 }
  0x89   : > { %v521_v50 = vpop.permute.xlu1 %520 }
  0x8b   : > { %v404_v51 = vpop.permute.xlu0 %403 }
  0x8c   : > { %v720_v3 = vsel %vm716_vm4, %v1798_v22, %v404_v51 }
  0x8d   : > { %v707_v52 = vpop.permute.xlu1 %706 }
  0x91   : > { %v629_v54 = vpop.permute.xlu1 %628 }
  0x92   : > { %v455_v12 = vpop.permute.xlu0 %454 }
  0x93   : > { %v730_v55 = vsel %vm728_vm5, %v718_v53, %v455_v12 }
  0x94   : > { %v741_v56 = vsel %vm739_vm6, %v730_v55, %v488_v48 }
  0x95   : > { %v752_v57 = vsel %vm750_vm7, %v741_v56, %v521_v50  ;;  %v457_v59 = vpop.permute.xlu1 %456 }
  0x96   : > { %v573_v58 = vpop.permute.xlu0 %572  ;;  %v732_v4 = vsel %vm728_vm5, %v720_v3, %v457_v59  ;;  %v2031_v3 = vld [vmem:[%s2107_s2] ss:$0 sm:$0xff] }
  0x97   : > { %v763_v60 = vsel %vm761_vm8, %v752_v57, %v573_v58 }
  0x98   : > { %v774_v62 = vsel %vm772_vm9, %v763_v60, %v629_v54 }
  0x99   : > { %v523_v63 = vpop.permute.xlu1 %522 }
  0x9a   : > { %v687_v26 = vpop.permute.xlu0 %686 }
  0x9b   : > { %v785_v1 = vsel %vm783_vm10, %v774_v62, %v687_v26 }
  0x9c   : > { %v796_v2 = vsel %vm794_vm11, %v785_v1, %v707_v52 }
  0x9d   : > { %1520 = vmatmul.mubr.msk.bf16.vlgmr.msra.gmra.mrb[0].mxu0 %vm848_vm12, %v796_v2  ;;  %v631_v7 = vpop.permute.xlu1 %630  ;;  %v1634_v2 = vld [vmem:[%s2108_s3] sm:$0xff]  }
  0x9e   : > { %v490_v6 = vpop.permute.xlu0 %489  ;;  %1523 = vmatprep.mubr.msk.bf16.mxu0 %vm1704_vm3, %v1695_v0  ;;  %1540 = vmatpush3.bf16.msra.mxu1 %v1634_v2 }
  0x9f   : > { %v743_v8 = vsel %vm739_vm6, %v732_v4, %v490_v6 }
  0xa0   : > { %v754_v9 = vsel %vm750_vm7, %v743_v8, %v523_v63 }
  0xa1   : > { %v709_v10 = vpop.permute.xlu1 %708 }
  0xa2   : > { %v575_v61 = vpop.permute.xlu0 %574 }
  0xa3   : > { %v765_v11 = vsel %vm761_vm8, %v754_v9, %v575_v61 }
  0xa4   : > { %v776_v13 = vsel %vm772_vm9, %v765_v11, %v631_v7 }
  0xa5   : > { %v459_v14 = vpop.permute.xlu1 %458 }
  0xa6   : > { %v689_v22 = vpop.permute.xlu0 %688 }
  0xa7   : > { %v787_v15 = vsel %vm783_vm10, %v776_v13, %v689_v22 }
  0xa8   : > { %v798_v17 = vsel %vm794_vm11, %v787_v15, %v709_v10 }
  0xa9   : > { %1524 = vmatmul.mubr.msk.bf16.gmra.mrb[4].mxu0 %vm848_vm12, %v798_v17  ;;  %v525_v19 = vpop.permute.xlu1 %524 }
  0xaa   : > { %v406_v18 = vpop.permute.xlu0 %405  ;;  %1527 = vmatprep.mubr.msk.bf16.mxu0 %vm1704_vm3, %v1695_v0 }
  0xab   : > { %v722_v20 = vsel %vm716_vm4, %v1825_v47, %v406_v18 }
  0xac   : > { %v734_v21 = vsel %vm728_vm5, %v722_v20, %v459_v14 }
  0xad   : > { %v633_v28 = vpop.permute.xlu1 %632 }
  0xae   : > { %v492_v23 = vpop.permute.xlu0 %491 }
  0xaf   : > { %v745_v29 = vsel %vm739_vm6, %v734_v21, %v492_v23 }
  0xb0   : > { %v756_v30 = vsel %vm750_vm7, %v745_v29, %v525_v19 }
  0xb1   : > { %v711_v32 = vpop.permute.xlu1 %710 }
  0xb2   : > { %v577_v31 = vpop.permute.xlu0 %576 }
  0xb3   : > { %v767_v5 = vsel %vm761_vm8, %v756_v30, %v577_v31 }
  0xb4   : > { %v778_v34 = vsel %vm772_vm9, %v767_v5, %v633_v28 }
  0xb5   : > { %v461_v36 = vpop.permute.xlu1 %460 }
  0xb6   : > { %v691_v35 = vpop.permute.xlu0 %690 }
  0xb7   : > { %v789_v37 = vsel %vm783_vm10, %v778_v34, %v691_v35 }
  0xb8   : > { %v800_v47 = vsel %vm794_vm11, %v789_v37, %v711_v32 }
  0xb9   : > { %1528 = vmatmul.mubr.msk.bf16.gmra.mrb[8].mxu0 %vm848_vm12, %v800_v47  ;;  %v527_v39 = vpop.permute.xlu1 %526 }
  0xba   : > { %v408_v38 = vpop.permute.xlu0 %407  ;;  %1531 = vmatprep.mubr.msk.bf16.mxu0 %vm1704_vm3, %v1695_v0 }
  0xbb   : > { %v724_v25 = vsel %vm716_vm4, %v1864_v16, %v408_v38  ;;  %v1377_v16 = vcombine.low %v1876_v24, %v1876_v24 }
  0xbc   : > { %v736_v27 = vsel %vm728_vm5, %v724_v25, %v461_v36 }
  0xbd   : > { %v635_v40 = vpop.permute.xlu1 %634 }
  0xbe   : > { %v494_v33 = vpop.permute.xlu0 %493 }
  0xbf   : > { %v747_v42 = vsel %vm739_vm6, %v736_v27, %v494_v33 }
  0xc0   : > { %v758_v43 = vsel %vm750_vm7, %v747_v42, %v527_v39 }
  0xc1   : > { %v713_v45 = vpop.permute.xlu1 %712 }
  0xc2   : > { %v579_v44 = vpop.permute.xlu0 %578 }
  0xc3   : > { %v769_v46 = vsel %vm761_vm8, %v758_v43, %v579_v44 }
  0xc4   : > { %v780_v41 = vsel %vm772_vm9, %v769_v46, %v635_v40 }
  0xc5   : > { %v463_v49 = vpop.permute.xlu1 %462 }
  0xc6   : > { %v693_v48 = vpop.permute.xlu0 %692 }
  0xc7   : > { %v791_v50 = vsel %vm783_vm10, %v780_v41, %v693_v48 }
  0xc8   : > { %v802_v51 = vsel %vm794_vm11, %v791_v50, %v713_v45 }
  0xc9   : > { %1532 = vmatmul.mubr.msk.bf16.gmra.mrb[12].mxu0 %vm848_vm12, %v802_v51  ;;  %v529_v53 = vpop.permute.xlu1 %528 }
  0xca   : > { %v410_v52 = vpop.permute.xlu0 %409  ;;  %1535 = vmatprep.mubr.msk.bf16.mxu0 %vm1704_vm3, %v1695_v0 }
  0xcb   : > { %v727_v12 = vsel %vm716_vm4, %v1377_v16, %v410_v52 }
  0xcc   : > { %v738_v54 = vsel %vm728_vm5, %v727_v12, %v463_v49 }
  0xcd   : > { %v637_v57 = vpop.permute.xlu1 %636 }
  0xce   : > { %v496_v55 = vpop.permute.xlu0 %495 }
  0xcf   : > { %v749_v56 = vsel %vm739_vm6, %v738_v54, %v496_v55 }
  0xd0   : > { %v760_v58 = vsel %vm750_vm7, %v749_v56, %v529_v53 }
  0xd1   : > { %v715_v60 = vpop.permute.xlu1 %714 }
  0xd2   : > { %v581_v24 = vpop.permute.xlu0 %580 }
  0xd3   : > { %v771_v59 = vsel %vm761_vm8, %v760_v58, %v581_v24 }
  0xd4   : > { %v782_v62 = vsel %vm772_vm9, %v771_v59, %v637_v57 }
  0xd6   : > { %v695_v26 = vpop.permute.xlu0 %694 }
  0xd7   : > { %v793_v63 = vsel %vm783_vm10, %v782_v62, %v695_v26 }
  0xd8   : > { %v804_v1 = vsel %vm794_vm11, %v793_v63, %v715_v60 }
  0xd9   : > { %1536 = vmatmul.mubr.msk.bf16.gmra.mrb[16].mxu0 %vm848_vm12, %v804_v1 }
 0x170   : > { %v897_v4 = vpop.f32.mrb[0].mxu0 }
 0x171   : > { %v898_v6 = vadd.f32 %v2031_v3, %v897_v4  ;;  %v1521_v7 = vpop.f32.mrb[1].mxu0 }
 0x172   : > { %v900_v8 = vpop.f32.mrb[2].mxu0 }
 0x173   : > { %v1416_v9 = vmul.f32 -1.442695, %v898_v6  ;;  %v901_v61 = vadd.f32 %v2031_v3, %v900_v8  ;;  %v1522_v10 = vpop.f32.mrb[3].mxu0 }
 0x175   : > { %1635 = vpow2.f32 %v1416_v9  ;;  %v1417_v11 = vmul.f32 -1.442695, %v901_v61 }
 0x177   : > { %1637 = vpow2.f32 %v1417_v11 }
 0x17c   : > { %v905_v13 = vpop.f32.mrb[4].mxu0 }
 0x17d   : > { %v906_v22 = vadd.f32 %v2031_v3, %v905_v13  ;;  %v1525_v14 = vpop.f32.mrb[5].mxu0 }
 0x17e   : > { %v908_v15 = vpop.f32.mrb[6].mxu0 }
 0x17f   : > { %v1636_v17 = vpop.eup %1635  ;;  %v1418_v18 = vmul.f32 -1.442695, %v906_v22  ;;  %v909_v19 = vadd.f32 %v2031_v3, %v908_v15  ;;  %v1526_v20 = vpop.f32.mrb[7].mxu0 }
 0x180   : > { %v962_v21 = vadd.f32 1.0, %v1636_v17 }
 0x181   : > { %v1638_v23 = vpop.eup %1637  ;;  %1639 = vpow2.f32 %v1418_v18  ;;  %v1419_v28 = vmul.f32 -1.442695, %v909_v19 }
 0x182   : > { %1641 = vrcp.f32 %v962_v21  ;;  %v963_v29 = vadd.f32 1.0, %v1638_v23 }
 0x183   : > { %1643 = vpow2.f32 %v1419_v28 }
 0x184   : > { %1645 = vrcp.f32 %v963_v29 }
 0x18b   : > { %v1640_v30 = vpop.eup %1639 }
 0x18c   : > { %v1642_v31 = vpop.eup %1641  ;;  %v964_v32 = vadd.f32 1.0, %v1640_v30  ;;  %v913_v5 = vpop.f32.mrb[8].mxu0 }
 0x18d   : > { %v1644_v34 = vpop.eup %1643  ;;  %v989_v35 = vmul.f32 %v1642_v31, %v898_v6  ;;  %v914_v36 = vadd.f32 %v2031_v3, %v913_v5  ;;  %v1529_v37 = vpop.f32.mrb[9].mxu0 }
 0x18e   : > { %v1646_v47 = vpop.eup %1645  ;;  %1647 = vrcp.f32 %v964_v32  ;;  %v965_v38 = vadd.f32 1.0, %v1644_v34  ;;  %v916_v39 = vpop.f32.mrb[10].mxu0  ;;  %v1434_v34 = vld [vmem:[%s2109_s4] ss:$0 sm:$0xff] }
 0x18f   : > { %v1452_v25 = vpack.c.bf16 %v989_v35, %v989_v35  ;;  %v990_v27 = vmul.f32 %v1646_v47, %v901_v61  ;;  %v1420_v33 = vmul.f32 -1.442695, %v914_v36  ;;  %v917_v40 = vadd.f32 %v2031_v3, %v916_v39  ;;  %v1530_v42 = vpop.f32.mrb[11].mxu0 }
 0x190   : > { %1649 = vrcp.f32 %v965_v38 }
 0x191   : > { %1036 = vst.msk [vmem:[%s2044_s10] sm:$0xf] %vm1035_vm13, %v1452_v25  ;;  %v998_v43 = vpack.c.bf16 %v990_v27, %v989_v35  ;;  %v1453_v44 = vpack.c.bf16 %v990_v27, %v990_v27  ;;  %1651 = vpow2.f32 %v1420_v33  ;;  %v1421_v45 = vmul.f32 -1.442695, %v917_v40 }
 0x193   : > { %1037 = vst.msk [vmem:[%s2044_s10 + $0x4] sm:$0xf] %vm1035_vm13, %v1453_v44  ;;  %1653 = vpow2.f32 %v1421_v45  ;;  %1542 = vmatmul.mubr.msk.bf16.vlgmr.msra.gmra.mrb[0].mxu1 %vm728_vm5, %v998_v43 }
 0x194   : > { %1545 = vmatprep.mubr.msk.bf16.mxu1 %vm1704_vm3, %v1695_v0 }
 0x198   : > { %v1648_v46 = vpop.eup %1647 }
 0x199   : > { %v991_v41 = vmul.f32 %v1648_v46, %v906_v22 }
 0x19a   : > { %v1650_v48 = vpop.eup %1649 }
 0x19b   : > { %v1652_v49 = vpop.eup %1651  ;;  %v1454_v50 = vpack.c.bf16 %v991_v41, %v991_v41  ;;  %v992_v16 = vmul.f32 %v1650_v48, %v909_v19 }
 0x19c   : > { %v966_v51 = vadd.f32 1.0, %v1652_v49  ;;  %v921_v52 = vpop.f32.mrb[12].mxu0 }
 0x19d   : > { %v1654_v53 = vpop.eup %1653  ;;  %1038 = vst.msk [vmem:[%s2044_s10 + $0x8] sm:$0xf] %vm1035_vm13, %v1454_v50  ;;  %v999_v12 = vpack.c.bf16 %v992_v16, %v991_v41  ;;  %v1455_v54 = vpack.c.bf16 %v992_v16, %v992_v16  ;;  %v922_v55 = vadd.f32 %v2031_v3, %v921_v52  ;;  %v1533_v56 = vpop.f32.mrb[13].mxu0 }
 0x19e   : > { %1655 = vrcp.f32 %v966_v51  ;;  %v967_v57 = vadd.f32 1.0, %v1654_v53  ;;  %v924_v58 = vpop.f32.mrb[14].mxu0 }
 0x19f   : > { %1039 = vst.msk [vmem:[%s2044_s10 + $0xc] sm:$0xf] %vm1035_vm13, %v1455_v54  ;;  %v1422_v24 = vmul.f32 -1.442695, %v922_v55  ;;  %v925_v59 = vadd.f32 %v2031_v3, %v924_v58  ;;  %v1534_v60 = vpop.f32.mrb[15].mxu0  ;;  %1546 = vmatmul.mubr.msk.bf16.gmra.mrb[4].mxu1 %vm728_vm5, %v999_v12 }
 0x1a0   : > { %1657 = vrcp.f32 %v967_v57  ;;  %1549 = vmatprep.mubr.msk.bf16.mxu1 %vm1704_vm3, %v1695_v0 }
 0x1a1   : > { %1659 = vpow2.f32 %v1422_v24  ;;  %v1423_v62 = vmul.f32 -1.442695, %v925_v59 }
 0x1a3   : > { %1661 = vpow2.f32 %v1423_v62 }
 0x1a8   : > { %v1656_v26 = vpop.eup %1655 }
 0x1a9   : > { %v993_v63 = vmul.f32 %v1656_v26, %v914_v36 }
 0x1aa   : > { %v1658_v1 = vpop.eup %1657 }
 0x1ab   : > { %v1660_v2 = vpop.eup %1659  ;;  %v1456_v4 = vpack.c.bf16 %v993_v63, %v993_v63  ;;  %v994_v6 = vmul.f32 %v1658_v1, %v917_v40 }
 0x1ac   : > { %v968_v7 = vadd.f32 1.0, %v1660_v2  ;;  %v929_v8 = vpop.f32.mrb[16].mxu0 }
 0x1ad   : > { %v1662_v9 = vpop.eup %1661  ;;  %1040 = vst.msk [vmem:[%s2044_s10 + $0x10] sm:$0xf] %vm1035_vm13, %v1456_v4  ;;  %v1000_v61 = vpack.c.bf16 %v994_v6, %v993_v63  ;;  %v1457_v10 = vpack.c.bf16 %v994_v6, %v994_v6  ;;  %v930_v11 = vadd.f32 %v2031_v3, %v929_v8  ;;  %v1537_v13 = vpop.f32.mrb[17].mxu0 }
 0x1ae   : > { %1663 = vrcp.f32 %v968_v7  ;;  %v969_v22 = vadd.f32 1.0, %v1662_v9  ;;  %v932_v14 = vpop.f32.mrb[18].mxu0 }
 0x1af   : > { %1041 = vst.msk [vmem:[%s2044_s10 + $0x14] sm:$0xf] %vm1035_vm13, %v1457_v10  ;;  %v1424_v15 = vmul.f32 -1.442695, %v930_v11  ;;  %v1538_v17 = vpop.f32.mrb[19].mxu0  ;;  %1550 = vmatmul.mubr.msk.bf16.gmra.mrb[8].mxu1 %vm728_vm5, %v1000_v61 }
 0x1b0   : > { %1665 = vrcp.f32 %v969_v22  ;;  %1553 = vmatprep.mubr.msk.bf16.mxu1 %vm1704_vm3, %v1695_v0 }
 0x1b1   : > { %1667 = vpow2.f32 %v1424_v15 }
 0x1b8   : > { %v1664_v18 = vpop.eup %1663 }
 0x1b9   : > { %v995_v19 = vmul.f32 %v1664_v18, %v922_v55 }
 0x1ba   : > { %v1666_v3 = vpop.eup %1665 }
 0x1bb   : > { %v1668_v20 = vpop.eup %1667  ;;  %v1458_v21 = vpack.c.bf16 %v995_v19, %v995_v19  ;;  %v996_v23 = vmul.f32 %v1666_v3, %v925_v59 }
 0x1bc   : > { %v970_v28 = vadd.f32 1.0, %v1668_v20 }
 0x1bd   : > { %1042 = vst.msk [vmem:[%s2044_s10 + $0x18] sm:$0xf] %vm1035_vm13, %v1458_v21  ;;  %v1001_v29 = vpack.c.bf16 %v996_v23, %v995_v19  ;;  %v1459_v30 = vpack.c.bf16 %v996_v23, %v996_v23 }
 0x1be   : > { %1669 = vrcp.f32 %v970_v28 }
 0x1bf   : > { %1043 = vst.msk [vmem:[%s2044_s10 + $0x1c] sm:$0xf] %vm1035_vm13, %v1459_v30  ;;  %1554 = vmatmul.mubr.msk.bf16.gmra.mrb[12].mxu1 %vm728_vm5, %v1001_v29 }
 0x1c0   : > { %1557 = vmatprep.mubr.msk.bf16.mxu1 %vm1704_vm3, %v1695_v0 }
 0x1c8   : > { %v1670_v31 = vpop.eup %1669 }
 0x1c9   : > { %v997_v32 = vmul.f32 %v1670_v31, %v930_v11 }
 0x1cb   : > { %v1002_v5 = vpack.c.bf16 %v997_v32, %v997_v32 }
 0x1cd   : > { %1044 = vst.msk [vmem:[%s2044_s10 + $0x20] sm:$0xf] %vm1035_vm13, %v1002_v5  ;;  %1558 = vmatmul.mubr.msk.bf16.gmra.mrb[16].mxu1 %vm728_vm5, %v1002_v5 }
 0x266   : > { %v1109_v35 = vpop.f32.mrb[0].mxu1 }
 0x267   : > { %v1543_v36 = vpop.f32.mrb[1].mxu1  ;;  %v1110_v47 = vadd.f32 %v1434_v34, %v1109_v35 }
 0x268   : > { %v1112_v37 = vpop.f32.mrb[2].mxu1 }
 0x269   : > { %v1113_v38 = vadd.f32 %v1434_v34, %v1112_v37  ;;  %v1544_v39 = vpop.f32.mrb[3].mxu1 }
 0x26b   : > { %v1473_v0 = vpack.c.bf16 %v1113_v38, %v1110_v47 }
 0x26d   : > { %1474 = vst [vmem:[%s2089_s15] sm:$0xff] %v1473_v0  }
 0x272   : > { %v1117_v25 = vpop.f32.mrb[4].mxu1 }
 0x273   : > { %v1547_v27 = vpop.f32.mrb[5].mxu1  ;;  %v1118_v40 = vadd.f32 %v1434_v34, %v1117_v25 }
 0x274   : > { %v1120_v33 = vpop.f32.mrb[6].mxu1 }
 0x275   : > { %v1121_v42 = vadd.f32 %v1434_v34, %v1120_v33  ;;  %v1548_v43 = vpop.f32.mrb[7].mxu1 }
 0x277   : > { %v1478_v44 = vpack.c.bf16 %v1121_v42, %v1118_v40 }
 0x279   : > { %1490 = vst [vmem:[%s2089_s15 + $0x8] sm:$0xff] %v1478_v44  }
 0x282   : > { %v1125_v45 = vpop.f32.mrb[8].mxu1 }
 0x283   : > { %v1551_v46 = vpop.f32.mrb[9].mxu1  ;;  %v1126_v48 = vadd.f32 %v1434_v34, %v1125_v45 }
 0x284   : > { %v1128_v41 = vpop.f32.mrb[10].mxu1 }
 0x285   : > { %v1129_v49 = vadd.f32 %v1434_v34, %v1128_v41  ;;  %v1552_v50 = vpop.f32.mrb[11].mxu1 }
 0x287   : > { %v1483_v16 = vpack.c.bf16 %v1129_v49, %v1126_v48 }
 0x289   : > { %1491 = vst [vmem:[%s2089_s15 + $0x10] sm:$0xff] %v1483_v16  }
 0x292   : > { %v1133_v51 = vpop.f32.mrb[12].mxu1 }
 0x293   : > { %v1555_v52 = vpop.f32.mrb[13].mxu1  ;;  %v1134_v12 = vadd.f32 %v1434_v34, %v1133_v51 }
 0x294   : > { %v1136_v53 = vpop.f32.mrb[14].mxu1 }
 0x295   : > { %v1137_v54 = vadd.f32 %v1434_v34, %v1136_v53  ;;  %v1556_v55 = vpop.f32.mrb[15].mxu1 }
 0x297   : > { %v1488_v56 = vpack.c.bf16 %v1137_v54, %v1134_v12 }
 0x299   : > { %1492 = vst [vmem:[%s2089_s15 + $0x18] sm:$0xff] %v1488_v56  }
 0x2a0   : > { %v1141_v57 = vpop.f32.mrb[16].mxu1 }
 0x2a1   : > { %v1142_v58 = vadd.f32 %v1434_v34, %v1141_v57  ;;  %v1559_v24 = vpop.f32.mrb[17].mxu1 }
 0x2a2   : > { %v1144_v59 = vpop.f32.mrb[18].mxu1 }
 0x2a3   : > { %v1469_v60 = vpack.c.bf16 %v1142_v58, %v1142_v58  ;;  %v1560_v62 = vpop.f32.mrb[19].mxu1 }
 0x2a5   : > { %1192 = vst [vmem:[%s2089_s15 + $0x20] sm:$0xf] %v1469_v60 }
 0x2a6 PF: > { %s17_s23 = sadd.s32 1, %s1693_s23   ;;  %s2112_s21 = smov %s1689_s22 }
 0x2a7   : > { %p14_p5 = scmp.ge.s32.totalorder %s17_s23, 4   ;;  %s2113_s22 = smov %s2115_s24 }
 0x2a9   :  { %16 = sbr.rel (!%p14_p5) target bundleno = 2 (0x2), region = 86 }

// kernel: yolov8_security_forward.3
= control target key start
LH: loop header
LB: loop body
LE: loop exit
PB: predicated region body
PF: predicated region fallthrough
CT: control target
= control target key end

     0   :  { %s991_s18 = smov 0   ;;  %s993_s19 = smov 0   ;;  %s1135_s0 = inlined_call_operand.vmem [shape: bf16[2,4,32,16], index: 0, kind: input, shape index: {}]   ;;  %s1136_s1 = inlined_call_operand.vmem [shape: bf16[144,32], index: 1, kind: input, shape index: {}]   ;;  %s1137_s2 = inlined_call_operand.vmem [shape: f32[1,32], index: 2, kind: input, shape index: {}]   ;;  %s1138_s3 = inlined_call_operand.vmem [shape: bf16[32,128], index: 3, kind: input, shape index: {}]   ;;  %s1139_s4 = inlined_call_operand.vmem [shape: f32[1,128], index: 4, kind: input, shape index: {}]   ;;  %s1140_s5 = inlined_call_operand.vmem [shape: bf16[2,24,128], index: 5, kind: output, shape index: {}]  }
   0x1   :  { %s995_s20 = smov 0  }
   0x2 LB: > { %s27_s21 = sadd.s32 1, %s947_s19  ;;  %p790_p0 = scmp.ge.s32.totalorder %s951_s20, 1  ;;  %s951_s20 = sphi %s995_s20, %s15_s20   ;;  %s947_s19 = sphi %s993_s19, %s1142_s19   ;;  %s943_s18 = sphi %s991_s18, %s1141_s18  }
   0x3   : > { %p29_p1 = scmp.ge.s32.totalorder %s27_s21, 2  ;;  %p201_p2 = scmp.lt.s32.totalorder %s951_s20, 3 }
   0x5   : > { %s1144_s21 = smov (%p29_p1, %s27_s21), 0  ;;  %p202_p3 = pnand %p790_p0, %p201_p2 }
   0x6   : > { %p233_p4 = scmp.lt.s32.totalorder (!%p202_p3), %s943_s18, 1  ;;  %v905_v0 = vld [vmem:[%s1136_s1] sm:$0xff] (!%p202_p3)   ;;  %v953_v1 = vmov (!%p202_p3), 0   ;;  %v906_v2 = vld [vmem:[%s1136_s1 + $0x8] sm:$0xff] (!%p202_p3)   ;;  %v907_v3 = vld [vmem:[%s1136_s1 + $0x10] sm:$0xff] (!%p202_p3)   ;;  %s954_s7 = smov (!%p202_p3), 48  }
   0x7   : > { %205 = sbr.rel (%p202_p3) target bundleno = 628 (0x274), region = 40  ;;  %530 = vmatprep.subr.bf16.mxu0 (!%p202_p3), %v953_v1  ;;  %vm301_vm0 = vsmask.f32 (!%p202_p3), 7424  ;;  %vm367_vm1 = vsmask.f32 (!%p202_p3), 5376  ;;  %s955_s8 = smov (!%p202_p3), 16  }
   0x8   : > { %531 = vmatpush1.bf16.msra.mxu0 (!%p202_p3), %v905_v0  ;;  %v908_v11 = vld [vmem:[%s1136_s1 + $0x18] sm:$0xff] (!%p202_p3)   ;;  %s956_s11 = smov (!%p202_p3), 64   ;;  %v909_v32 = vld [vmem:[%s1136_s1 + $0x20] sm:$0xff] (!%p202_p3)   ;;  %s957_s14 = smov (!%p202_p3), 32   ;;  %v910_v46 = vld [vmem:[%s1136_s1 + $0x28] sm:$0xff] (!%p202_p3)   ;;  %vm403_vm2 = vcmask (!%p202_p3), 1044480  }
   0x9   : > { %532 = vmatprep.subr.bf16.mxu0 (!%p202_p3), %v953_v1  ;;  %s958_s17 = smov (!%p202_p3), 96   ;;  %v912_v58 = vld [vmem:[%s1136_s1 + $0x30] sm:$0xff] (!%p202_p3)   ;;  %vm407_vm3 = vcmask (!%p202_p3), 130048   ;;  %s959_s24 = smov (!%p202_p3), 80   ;;  %v913_v62 = vld [vmem:[%s1136_s1 + $0x38] sm:$0xff] (!%p202_p3)   ;;  %v914_v0 = vld [vmem:[%s1136_s1 + $0x40] sm:$0xff] (!%p202_p3)  }
   0xa   : > { %s960_s27 = smov (!%p202_p3), 112   ;;  %vm418_vm4 = vcmask (!%p202_p3), 392192   ;;  %vm413_vm5 = vcmask (!%p202_p3), 261120   ;;  %vm423_vm6 = vcmask (!%p202_p3), 523264   ;;  %vm428_vm7 = vcmask (!%p202_p3), 654336  }
   0xb   : > { %vm433_vm8 = vcmask (!%p202_p3), 785408   ;;  %vm438_vm9 = vcmask (!%p202_p3), 916480  }
   0xc   : > { %533 = vmatpush1.bf16.msra.mxu0 (!%p202_p3), %v906_v2 }
   0xd   : > { %534 = vmatprep.subr.bf16.mxu0 (!%p202_p3), %v953_v1 }
   0xe   : > { %s1146_s18 = smov (!%p233_p4, %s943_s18), 1 }
   0xf   : > { %s841_s26 = sshll.u32 %s1146_s18, 6 }
  0x10   : > { %s1023_s29 = scalar_lea.vmem %s1135_s0, %s841_s26  ;;  %535 = vmatpush1.bf16.msra.mxu0 %v907_v3 }
  0x11   : > { %v895_v4 = vld [vmem:[%s1023_s29 + $0x20] sm:$0xff]   ;;  %v896_v5 = vld [vmem:[%s1023_s29 + $0x10] sm:$0xff]   ;;  %v1035_v9 = vld [vmem:[%s1023_s29 + $0x8] sm:$0xf]  ;;  %536 = vmatprep.subr.bf16.mxu0 %v953_v1 }
  0x12   : > { %329 = vrot.lane.b32.xlu1 %v895_v4, %s954_s7  ;;  %v897_v6 = vld [vmem:[%s1023_s29 + $0x30] sm:$0xff]   ;;  %v351_v7 = vshll.u32 %v895_v4, 16  ;;  %294 = vrot.lane.b32.xlu0 %v896_v5, %s955_s8  ;;  %v383_v8 = vshrl.u32 %v896_v5, 16  ;;  %v257_v10 = vld [vmem:[%s1023_s29 + $0xc] sm:$0xf]  ;;  %v386_v15 = vshll.u32 %v896_v5, 16 }
  0x13   : > { %v1042_v12 = vcombine.low %v1035_v9, %v257_v10  ;;  %v796_v13 = vld [vmem:[%s1023_s29 + $0x18] sm:$0xf]  ;;  %v797_v14 = vld [vmem:[%s1023_s29 + $0x1c] sm:$0xf]  ;;  %v1047_v17 = vld [vmem:[%s1023_s29] sm:$0xff]   ;;  %v349_v23 = vshrl.u32 %v895_v4, 16 }
  0x14   : > { %v815_v16 = vcombine.low %v796_v13, %v797_v14  ;;  %v800_v18 = vld [vmem:[%s1023_s29 + $0x28] sm:$0xf]  ;;  %v808_v21 = vcombine.low %v796_v13, %v796_v13  ;;  %v801_v22 = vld [vmem:[%s1023_s29 + $0x2c] sm:$0xf]  ;;  %v303_v25 = vshrl.u32 %v1047_v17, 16  ;;  %v305_v26 = vshll.u32 %v1047_v17, 16  ;;  %537 = vmatpush1.bf16.msra.mxu0 %v908_v11 }
  0x15   : > { %v310_v19 = vshll.u32 %v1042_v12, 16  ;;  %v314_v20 = vshrl.u32 %v1042_v12, 16  ;;  %v353_v27 = vrot.slane %v351_v7, 1  ;;  %v814_v31 = vcombine.low %v800_v18, %v801_v22  ;;  %538 = vmatprep.subr.bf16.mxu0 %v953_v1  ;;  %v904_v63 = vld [vmem:[%s1023_s29 + $0x38] ss:$0 sps:$4 sm:$0xff]  }
  0x16   : > { %341 = vrot.lane.b32.xlu1 %v897_v6, %s956_s11  ;;  %v391_v24 = vshrl.u32 %v815_v16, 16  ;;  %v394_v33 = vshll.u32 %v815_v16, 16  ;;  %v307_v34 = vrot.slane %v305_v26, 1  ;;  %v368_v35 = vrot.slane %v303_v25, 2 }
  0x17   : > { %v312_v28 = vrot.slane %v310_v19, 1  ;;  %v371_v29 = vrot.slane %v314_v20, 2  ;;  %v372_v30 = vrot.slane %v310_v19, 3  ;;  %v369_v36 = vrot.slane %v305_v26, 3 }
  0x18   : > { %v356_v39 = vshll.u32 %v814_v31, 16  ;;  %v308_v40 = vor.u32 %v307_v34, %v303_v25  ;;  %v354_v42 = vor.u32 %v353_v27, %v349_v23  ;;  %v385_v43 = vrot.slane %v383_v8, 2  ;;  %539 = vmatpush1.bf16.msra.mxu0 %v909_v32  ;;  %v816_v32 = vld [vmem:[%s1137_s2] ss:$0 sm:$0xff] }
  0x19   : > { %v316_v37 = vor.u32 %v314_v20, %v312_v28  ;;  %v373_v38 = vor.u32 %v372_v30, %v371_v29  ;;  %v370_v41 = vor.u32 %v369_v36, %v368_v35  ;;  %v388_v44 = vrot.slane %v386_v15, 3  ;;  %540 = vmatprep.subr.bf16.mxu0 %v953_v1  ;;  %v915_v30 = vld [vmem:[%s1138_s3] sm:$0xff]  }
  0x1a   : > { %296 = vrot.lane.b32.xlu1 %v808_v21, %s955_s8  ;;  %v393_v45 = vrot.slane %v391_v24, 2  ;;  %v313_v47 = vsel %vm301_vm0, %v308_v40, %v312_v28  ;;  %v358_v49 = vrot.slane %v356_v39, 1  ;;  %v396_v50 = vrot.slane %v394_v33, 3  ;;  %854 = vmatprep.subr.bf16.mxu1 %v915_v30 }
  0x1b   : > { %319 = vrot.lane.b32.xlu0 %v316_v37, %s957_s14  ;;  %v374_v48 = vsel %vm367_vm1, %v370_v41, %v373_v38  ;;  %v811_v51 = vcombine.low %v800_v18, %v800_v18  ;;  %v360_v52 = vshrl.u32 %v814_v31, 16  ;;  %v404_v53 = vrot.slane %v1047_v17, 3  ;;  %855 = vmatpush3.bf16.msra.mxu1 %v915_v30  ;;  %v916_v31 = vld [vmem:[%s1138_s3 + $0x8] sm:$0xff]  }
  0x1c   : > { %v405_v54 = vrot.slane %v1042_v12, 3  ;;  %v359_v55 = vsel %vm301_vm0, %v354_v42, %v358_v49  ;;  %v389_v56 = vor.u32 %v388_v44, %v385_v43  ;;  %v397_v57 = vor.u32 %v396_v50, %v393_v45  ;;  %541 = vmatpush1.bf16.msra.mxu0 %v910_v46  ;;  %856 = vmatprep.subr.bf16.mxu1 %v916_v31 }
  0x1d   : > { %v362_v60 = vor.u32 %v360_v52, %v358_v49  ;;  %542 = vmatprep.subr.bf16.mxu0 %v953_v1  ;;  %v806_v13 = vcombine.low %v1035_v9, %v1035_v9 }
  0x1e   : > { %375 = vrot.lane.b32.xlu1 %v374_v48, %s958_s17  ;;  %v406_v59 = vsel %vm403_vm2, %v404_v53, %v405_v54  ;;  %v398_v61 = vsel %vm367_vm1, %v389_v56, %v397_v57 }
  0x1f   : > { %317 = vrot.lane.b32.xlu0 %v313_v47, %s957_s14  ;;  %826 = vmatprep.mubr.msk.bf16.mxu0 %vm407_vm3, %v406_v59 }
  0x20   : > { %543 = vmatpush1.bf16.msra.mxu0 %v912_v58  ;;  %857 = vmatpush3.bf16.msra.mxu1 %v916_v31 }
  0x21   : > { %544 = vmatprep.subr.bf16.mxu0 %v953_v1 }
  0x22   : > { %331 = vrot.lane.b32.xlu1 %v811_v51, %s954_s7 }
  0x23   : > { %363 = vrot.lane.b32.xlu0 %v359_v55, %s959_s24 }
  0x24   : > { %545 = vmatpush1.bf16.msra.mxu0 %v913_v62 }
  0x25   : > { %546 = vmatprep.subr.bf16.mxu0 %v953_v1 }
  0x26   : > { %365 = vrot.lane.b32.xlu1 %v362_v60, %s959_s24 }
  0x27   : > { %399 = vrot.lane.b32.xlu0 %v398_v61, %s960_s27  ;;  %v831_v61 = vld [vmem:[%s1139_s4] ss:$0 sm:$0xff] }
  0x28   : > { %547 = vmatpush1.bf16.msra.mxu0 %v914_v0 }
  0x2a   : > { %401 = vrot.lane.b32.xlu1 %v397_v57, %s960_s27 }
  0x2b   : > { %343 = vrot.lane.b32.xlu0 %v904_v63, %s956_s11  ;;  %s862_s11 = smul.u32 12, %s1146_s18 }
  0x2d   : > { %s246_s16 = scalar_lea.vmem %s1140_s5, %s862_s11 }
  0x2f   : > { %377 = vrot.lane.b32.xlu0 %v373_v38, %s958_s17 }
  0x84   : > { %v330_v2 = vpop.permute.xlu1 %329  ;;  %v295_v3 = vpop.permute.xlu0 %294 }
  0x85   : > { %v409_v8 = vsel %vm407_vm3, %v1047_v17, %v295_v3 }
  0x88   : > { %v342_v4 = vpop.permute.xlu1 %341 }
  0x8c   : > { %v297_v5 = vpop.permute.xlu1 %296 }
  0x8d   : > { %v320_v6 = vpop.permute.xlu0 %319  ;;  %v412_v17 = vsel %vm407_vm3, %v806_v13, %v297_v5 }
  0x8e   : > { %v417_v22 = vsel %vm413_vm5, %v412_v17, %v320_v6 }
  0x90   : > { %v376_v7 = vpop.permute.xlu1 %375 }
  0x91   : > { %v318_v10 = vpop.permute.xlu0 %317 }
  0x92   : > { %v415_v1 = vsel %vm413_vm5, %v409_v8, %v318_v10 }
  0x93   : > { %v420_v11 = vsel %vm418_vm4, %v415_v1, %v330_v2 }
  0x94   : > { %v425_v12 = vsel %vm423_vm6, %v420_v11, %v342_v4  ;;  %v332_v16 = vpop.permute.xlu1 %331 }
  0x95   : > { %v364_v14 = vpop.permute.xlu0 %363  ;;  %v422_v9 = vsel %vm418_vm4, %v417_v22, %v332_v16 }
  0x96   : > { %v430_v15 = vsel %vm428_vm7, %v425_v12, %v364_v14 }
  0x97   : > { %v435_v19 = vsel %vm433_vm8, %v430_v15, %v376_v7 }
  0x98   : > { %v366_v21 = vpop.permute.xlu1 %365 }
  0x99   : > { %v400_v18 = vpop.permute.xlu0 %399 }
  0x9a   : > { %v440_v20 = vsel %vm438_vm9, %v435_v19, %v400_v18 }
  0x9b   : > { %563 = vmatmul.mubr.bf16.vlgmr.msra.gmra.mrb[0].mxu0 %v440_v20 }
  0x9c   : > { %827 = vmatprep.mubr.msk.bf16.mxu0 %vm407_vm3, %v405_v54  ;;  %v402_v25 = vpop.permute.xlu1 %401 }
  0x9d   : > { %v344_v23 = vpop.permute.xlu0 %343 }
  0x9e   : > { %v427_v24 = vsel %vm423_vm6, %v422_v9, %v344_v23 }
  0x9f   : > { %v432_v26 = vsel %vm428_vm7, %v427_v24, %v366_v21 }
  0xa1   : > { %v378_v27 = vpop.permute.xlu0 %377 }
  0xa2   : > { %v437_v28 = vsel %vm433_vm8, %v432_v26, %v378_v27 }
  0xa3   : > { %v443_v29 = vsel %vm438_vm9, %v437_v28, %v402_v25 }
  0xa4   : > { %571 = vmatmul.mubr.bf16.gmra.mrb[4].mxu0 %v443_v29 }
 0x16e   : > { %v564_v33 = vpop.f32.mrb[0].mxu0 }
 0x16f   : > { %v565_v34 = vadd.f32 %v816_v32, %v564_v33  ;;  %v566_v35 = vpop.f32.mrb[1].mxu0 }
 0x170   : > { %v567_v36 = vpop.f32.mrb[2].mxu0 }
 0x171   : > { %v828_v37 = vmul.f32 -1.442695, %v565_v34  ;;  %v568_v38 = vadd.f32 %v816_v32, %v567_v36  ;;  %v569_v39 = vpop.f32.mrb[3].mxu0 }
 0x173   : > { %917 = vpow2.f32 %v828_v37  ;;  %v829_v40 = vmul.f32 -1.442695, %v568_v38 }
 0x175   : > { %919 = vpow2.f32 %v829_v40 }
 0x177   : > { %v572_v41 = vpop.f32.mrb[4].mxu0 }
 0x178   : > { %v573_v42 = vadd.f32 %v816_v32, %v572_v41  ;;  %v574_v43 = vpop.f32.mrb[5].mxu0 }
 0x179   : > { %v575_v44 = vpop.f32.mrb[6].mxu0 }
 0x17a   : > { %v830_v45 = vmul.f32 -1.442695, %v573_v42  ;;  %v576_v46 = vpop.f32.mrb[7].mxu0 }
 0x17c   : > { %921 = vpow2.f32 %v830_v45 }
 0x17d   : > { %v918_v47 = vpop.eup %917 }
 0x17e   : > { %v587_v48 = vadd.f32 1.0, %v918_v47 }
 0x17f   : > { %v920_v49 = vpop.eup %919 }
 0x180   : > { %923 = vrcp.f32 %v587_v48  ;;  %v588_v50 = vadd.f32 1.0, %v920_v49 }
 0x182   : > { %925 = vrcp.f32 %v588_v50 }
 0x186   : > { %v922_v51 = vpop.eup %921 }
 0x187   : > { %v589_v52 = vadd.f32 1.0, %v922_v51 }
 0x189   : > { %927 = vrcp.f32 %v589_v52 }
 0x18a   : > { %v924_v53 = vpop.eup %923 }
 0x18b   : > { %v596_v55 = vmul.f32 %v924_v53, %v565_v34 }
 0x18c   : > { %v926_v54 = vpop.eup %925 }
 0x18d   : > { %v597_v56 = vmul.f32 %v926_v54, %v568_v38 }
 0x18f   : > { %v599_v57 = vpack.c.bf16 %v597_v56, %v596_v55 }
 0x191   : > { %858 = vmatprep.mubr.msk.bf16.mxu1 %vm413_vm5, %v599_v57 }
 0x193   : > { %v928_v58 = vpop.eup %927 }
 0x194   : > { %v598_v59 = vmul.f32 %v928_v58, %v573_v42 }
 0x196   : > { %v600_v60 = vpack.c.bf16 %v598_v59, %v598_v59 }
 0x198   : > { %859 = vmatmul.mubr.msk.bf16.vlgmr.msra.gmra.mrb[0].mxu1 %vm413_vm5, %v600_v60 }
 0x26b   : > { %v860_v62 = vpop.f32.mrb[0].mxu1 }
 0x26c   : > { %v673_v63 = vadd.f32 %v860_v62, %v831_v61  ;;  %v664_v0 = vpop.f32.mrb[1].mxu1 }
 0x26d   : > { %v861_v2 = vpop.f32.mrb[2].mxu1  ;;  %v665_v5 = vadd.f32 %v831_v61, %v664_v0 }
 0x26e   : > { %v844_v3 = vpack.c.bf16 %v673_v63, %v673_v63  ;;  %v667_v4 = vpop.f32.mrb[3].mxu1 }
 0x26f   : > { %v668_v6 = vadd.f32 %v831_v61, %v667_v4 }
 0x270   : > { %693 = vst [vmem:[%s246_s16 + $0x8] sm:$0xf] %v844_v3 }
 0x271   : > { %v848_v7 = vpack.c.bf16 %v668_v6, %v665_v5 }
 0x273   : > { %849 = vst [vmem:[%s246_s16] sm:$0xff] %v848_v7  }
 0x274 PF: > { %s15_s20 = sadd.s32 1, %s951_s20   ;;  %s1141_s18 = smov %s947_s19 }
 0x275   : > { %p12_p5 = scmp.ge.s32.totalorder %s15_s20, 4   ;;  %s1142_s19 = smov %s1144_s21 }
 0x277   :  { %14 = sbr.rel (!%p12_p5) target bundleno = 2 (0x2), region = 74 }

</bundles_post_ra>
